<compile_context>
chip_gen: v6e
topology: v6e:2x2x1
jax: 0.10.0
libtpu: 0.0.40
codegen_flags: <defaults>
</compile_context>

<pallas_src>
import functools

import jax
import jax.numpy as jnp
import numpy as np
from jax.experimental import pallas as pl
from jax.experimental.pallas import tpu as pltpu

# ---------------- model hyper-params (small, consistent demo sizes) ----------------
SEQ = 8        # sequence length
BSZ = 4        # batch size
NINP = 32      # input feature dim  (original: 300)
NHID = 32      # hidden dim         (original: 64); NINP == NHID so the shared pt works for layer 2
K_LEVELS = 2   # pyramid levels in PyramidalTransform (self.k)
K_LAYERS = 2   # stacked PRU layers (forward loops `for l in range(self.k)`)
NCLASS = 3     # decoder output classes


# ---------------- fused Pallas kernel ----------------
def fused_net_kernel(gin0_ref, w_in_ref, w_h_ref, b_ref, wd_ref, bd_ref,
                     h0_ref, c0_ref,
                     dec_ref, h_out_ref, c_out_ref):
    """Whole Net.forward in one kernel invocation (no grid).

    gin0_ref : (SEQ, BSZ, 4*NHID)  precomputed layer-0 input gates  x @ wp_eff + b
    w_in_ref : (NINP, 4*NHID)      folded pyramidal input weight (used by layer >= 1)
    w_h_ref  : (NHID, 4*NHID)      grouped-linear hidden weight (g=1 -> dense)
    b_ref    : (1, 4*NHID)         fused bias  bp + bh
    wd_ref   : (NHID, NCLASS), bd_ref: (1, NCLASS)   decoder
    h0/c0    : (K_LAYERS, BSZ, NHID) initial hidden/cell per stacked layer
    dec_ref  : (SEQ, BSZ, NCLASS)  decoded model output
    h_out/c_out : (K_LAYERS, BSZ, NHID) final hidden/cell per stacked layer
    """
    seq = gin0_ref.shape[0]
    nhid = w_h_ref.shape[0]

    w_in = w_in_ref[...]
    w_h = w_h_ref[...]
    b = b_ref[...]

    def gate_step(gates, h, c):
        f = gates[:, 0 * nhid:1 * nhid]
        g = gates[:, 1 * nhid:2 * nhid]
        i = gates[:, 2 * nhid:3 * nhid]
        o = gates[:, 3 * nhid:4 * nhid]
        c_new = jax.nn.sigmoid(f) * c + jax.nn.sigmoid(i) * jnp.tanh(g)
        h_new = jax.nn.sigmoid(o) * jnp.tanh(c_new)
        return h_new, c_new

    # ---- layer 0: input projection already hoisted out of the recurrence ----
    h = h0_ref[0]
    c = c0_ref[0]
    outs = []
    for t in range(seq):                       # static unrolled time loop, h/c live in vregs
        gates = gin0_ref[t] + jnp.dot(h, w_h, preferred_element_type=jnp.float32)
        h, c = gate_step(gates, h, c)
        outs.append(h)
    h_out_ref[0] = h
    c_out_ref[0] = c

    # ---- remaining stacked layers (shared pt / glt weights, as in the original) ----
    for l in range(1, K_LAYERS):
        h = h0_ref[l]
        c = c0_ref[l]
        prev = outs
        outs = []
        for t in range(seq):
            gates = (jnp.dot(prev[t], w_in, preferred_element_type=jnp.float32) + b
                     + jnp.dot(h, w_h, preferred_element_type=jnp.float32))
            h, c = gate_step(gates, h, c)
            outs.append(h)
        h_out_ref[l] = h
        c_out_ref[l] = c

    # ---- decoder fused in (per-timestep tiny matmul; avoids any in-kernel reshape/stack) ----
    wd = wd_ref[...]
    bd = bd_ref[...]
    for t in range(seq):
        dec_ref[t] = jnp.dot(outs[t], wd, preferred_element_type=jnp.float32) + bd


# ---------------- wrapper ----------------
@functools.partial(jax.jit, static_argnames=())
def net_forward(x, h_stack, c_stack, params):
    """Mirrors Net.forward: K_LAYERS stacked PRU layers (shared pt/glt) + linear decoder.

    x: (seq, bsz, ninp); h_stack/c_stack: (K_LAYERS, bsz, nhid).
    Returns (model_output (seq,bsz,NCLASS), new_h (K_LAYERS,bsz,nhid), new_c (...)).
    """
    seq, bsz, ninp = x.shape
    nhid = params["wh"].shape[0]

    # Fold pyramid level-1 (avg-pool-by-2 over features) into the level-0 weight: exact rewrite
    #   x @ wp0 + (0.5*(x[...,0::2]+x[...,1::2])) @ wp1 == x @ wp_eff
    wp_eff = params["wp0"]
    wp_eff = wp_eff.at[0::2].add(0.5 * params["wp1"])
    wp_eff = wp_eff.at[1::2].add(0.5 * params["wp1"])
    b = params["bp"] + params["bh"]

    # Hoist the time-independent layer-0 input projection out of the recurrence
    # as one batched matmul (runs in XLA, off the serial critical path).
    gin0 = jnp.einsum("sbi,ij->sbj", x, wp_eff,
                      preferred_element_type=jnp.float32) + b

    vmem = pl.BlockSpec(memory_space=pltpu.MemorySpace.VMEM)
    dec, h_t, c_t = pl.pallas_call(
        fused_net_kernel,
        in_specs=[vmem] * 8,
        out_specs=[vmem] * 3,
        out_shape=[
            jax.ShapeDtypeStruct((seq, bsz, NCLASS), jnp.float32),
            jax.ShapeDtypeStruct((K_LAYERS, bsz, nhid), jnp.float32),
            jax.ShapeDtypeStruct((K_LAYERS, bsz, nhid), jnp.float32),
        ],
    )(gin0, wp_eff, params["wh"], b, params["wd"], params["bd"], h_stack, c_stack)
    return dec, h_t, c_t


# ---------------- pure-JAX reference (unfused / unfolded, for correctness check) ----------------
def ref_forward(x, h_stack, c_stack, p):
    def layer(xs, h, c):
        xp_all = 0.5 * (xs[..., 0::2] + xs[..., 1::2])
        outs = []
        for t in range(xs.shape[0]):
            gates = (xs[t] @ p["wp0"] + xp_all[t] @ p["wp1"] + p["bp"]
                     + h @ p["wh"] + p["bh"])
            f, g, i, o = jnp.split(gates, 4, axis=-1)
            c = jax.nn.sigmoid(f) * c + jax.nn.sigmoid(i) * jnp.tanh(g)
            h = jax.nn.sigmoid(o) * jnp.tanh(c)
            outs.append(h)
        return jnp.stack(outs, 0), h, c

    out = x
    hs, cs = [], []
    for l in range(K_LAYERS):
        out, h_t, c_t = layer(out, h_stack[l], c_stack[l])
        hs.append(h_t)
        cs.append(c_t)
    seq, bsz, nhid = out.shape
    dec = out.reshape(seq * bsz, nhid) @ p["wd"] + p["bd"]
    return dec.reshape(seq, bsz, -1), jnp.stack(hs, 0), jnp.stack(cs, 0)


# ---------------- parameter init ----------------
def init_params(key):
    ks = jax.random.split(key, 8)
    scale_in = 1.0 / np.sqrt(NINP)
    scale_h = 1.0 / np.sqrt(NHID)
    params = {
        # PyramidalTransform: level-0 (full features) and level-1 (2x subsampled) weights
        "wp0": jax.random.normal(ks[0], (NINP, 4 * NHID), jnp.float32) * scale_in,
        "wp1": jax.random.normal(ks[1], (NINP // 2, 4 * NHID), jnp.float32) * scale_in,
        "bp": jax.random.normal(ks[2], (1, 4 * NHID), jnp.float32) * 0.01,
        # GroupedLinear, g=1
        "wh": jax.random.normal(ks[3], (NHID, 4 * NHID), jnp.float32) * scale_h,
        "bh": jax.random.normal(ks[4], (1, 4 * NHID), jnp.float32) * 0.01,
        # decoder  (TODO(synk): original nn.Linear(4, 3) is dim-inconsistent; uses NHID -> 3)
        "wd": jax.random.normal(ks[5], (NHID, NCLASS), jnp.float32) * scale_h,
        "bd": jax.random.normal(ks[6], (1, NCLASS), jnp.float32) * 0.01,
    }
    return params


if __name__ == "__main__":
    key = jax.random.PRNGKey(0)
    kx, kp = jax.random.split(key)

    x = jax.random.normal(kx, (SEQ, BSZ, NINP), jnp.float32)
    params = init_params(kp)

    # init_hidden-equivalent: zero (h, c) per stacked layer
    h0 = jnp.zeros((K_LAYERS, BSZ, NHID), jnp.float32)
    c0 = jnp.zeros((K_LAYERS, BSZ, NHID), jnp.float32)

    model_out, new_h, new_c = net_forward(x, h0, c0, params)
    jax.block_until_ready((model_out, new_h, new_c))

    ref_out, ref_h, ref_c = ref_forward(x, h0, c0, params)
    np.testing.assert_allclose(np.asarray(model_out), np.asarray(ref_out), rtol=1e-4, atol=1e-4)
    np.testing.assert_allclose(np.asarray(new_h), np.asarray(ref_h), rtol=1e-4, atol=1e-4)
    np.testing.assert_allclose(np.asarray(new_c), np.asarray(ref_c), rtol=1e-4, atol=1e-4)

    print("KERNEL_OK")
</pallas_src>

<mosaic_0001>
module attributes {stable_mosaic.version = 11 : i64} {
  func.func @fused_net_kernel(%arg0: memref<8x4x128xf32, #tpu.memory_space<vmem>>, %arg1: memref<32x128xf32, #tpu.memory_space<vmem>>, %arg2: memref<32x128xf32, #tpu.memory_space<vmem>>, %arg3: memref<1x128xf32, #tpu.memory_space<vmem>>, %arg4: memref<32x3xf32, #tpu.memory_space<vmem>>, %arg5: memref<1x3xf32, #tpu.memory_space<vmem>>, %arg6: memref<2x4x32xf32, #tpu.memory_space<vmem>>, %arg7: memref<2x4x32xf32, #tpu.memory_space<vmem>>, %arg8: memref<8x4x3xf32, #tpu.memory_space<vmem>>, %arg9: memref<2x4x32xf32, #tpu.memory_space<vmem>>, %arg10: memref<2x4x32xf32, #tpu.memory_space<vmem>>) attributes {dimension_semantics = [], scalar_prefetch = 0 : i64, scratch_operands = 0 : i64, tpu.core_type = #tpu.core_type<tc>} {
    %c0 = arith.constant 0 : index
    %c0_0 = arith.constant 0 : index
    %0 = vector.load %arg1[%c0, %c0_0] : memref<32x128xf32, #tpu.memory_space<vmem>>, vector<32x128xf32>
    %c0_1 = arith.constant 0 : index
    %c0_2 = arith.constant 0 : index
    %1 = vector.load %arg2[%c0_1, %c0_2] : memref<32x128xf32, #tpu.memory_space<vmem>>, vector<32x128xf32>
    %c0_3 = arith.constant 0 : index
    %c0_4 = arith.constant 0 : index
    %2 = vector.load %arg3[%c0_3, %c0_4] : memref<1x128xf32, #tpu.memory_space<vmem>>, vector<1x128xf32>
    %c0_5 = arith.constant 0 : index
    %c0_6 = arith.constant 0 : index
    %c0_7 = arith.constant 0 : index
    %3 = vector.load %arg6[%c0_5, %c0_6, %c0_7] : memref<2x4x32xf32, #tpu.memory_space<vmem>>, vector<1x4x32xf32>
    %4 = vector.shape_cast %3 : vector<1x4x32xf32> to vector<4x32xf32>
    %c0_8 = arith.constant 0 : index
    %c0_9 = arith.constant 0 : index
    %c0_10 = arith.constant 0 : index
    %5 = vector.load %arg7[%c0_8, %c0_9, %c0_10] : memref<2x4x32xf32, #tpu.memory_space<vmem>>, vector<1x4x32xf32>
    %6 = vector.shape_cast %5 : vector<1x4x32xf32> to vector<4x32xf32>
    %c0_11 = arith.constant 0 : index
    %c0_12 = arith.constant 0 : index
    %c0_13 = arith.constant 0 : index
    %7 = vector.load %arg0[%c0_11, %c0_12, %c0_13] : memref<8x4x128xf32, #tpu.memory_space<vmem>>, vector<1x4x128xf32>
    %8 = vector.shape_cast %7 : vector<1x4x128xf32> to vector<4x128xf32>
    %cst = arith.constant dense<0.000000e+00> : vector<4x128xf32>
    %9 = tpu.matmul %4, %1, %cst {dimension_numbers = #tpu.dot_dimension_numbers<[1], [0], [0], [1], [0, 0, 1, 1], [], []>} : vector<4x32xf32>, vector<32x128xf32>, vector<4x128xf32> -> vector<4x128xf32>
    %10 = arith.addf %8, %9 : vector<4x128xf32>
    %11 = vector.extract_strided_slice %10 {offsets = [0, 0], sizes = [4, 32], strides = [1, 1]} : vector<4x128xf32> to vector<4x32xf32>
    %12 = vector.extract_strided_slice %10 {offsets = [0, 32], sizes = [4, 32], strides = [1, 1]} : vector<4x128xf32> to vector<4x32xf32>
    %13 = vector.extract_strided_slice %10 {offsets = [0, 64], sizes = [4, 32], strides = [1, 1]} : vector<4x128xf32> to vector<4x32xf32>
    %14 = vector.extract_strided_slice %10 {offsets = [0, 96], sizes = [4, 32], strides = [1, 1]} : vector<4x128xf32> to vector<4x32xf32>
    %15 = arith.negf %11 : vector<4x32xf32>
    %16 = math.exp %15 : vector<4x32xf32>
    %cst_14 = arith.constant 1.000000e+00 : f32
    %17 = vector.broadcast %cst_14 : f32 to vector<4x32xf32>
    %18 = arith.addf %17, %16 : vector<4x32xf32>
    %19 = arith.divf %17, %18 : vector<4x32xf32>
    %20 = arith.mulf %19, %6 : vector<4x32xf32>
    %21 = arith.negf %13 : vector<4x32xf32>
    %22 = math.exp %21 : vector<4x32xf32>
    %cst_15 = arith.constant 1.000000e+00 : f32
    %23 = vector.broadcast %cst_15 : f32 to vector<4x32xf32>
    %24 = arith.addf %23, %22 : vector<4x32xf32>
    %25 = arith.divf %23, %24 : vector<4x32xf32>
    %26 = math.tanh %12 : vector<4x32xf32>
    %27 = arith.mulf %25, %26 : vector<4x32xf32>
    %28 = arith.addf %20, %27 : vector<4x32xf32>
    %29 = arith.negf %14 : vector<4x32xf32>
    %30 = math.exp %29 : vector<4x32xf32>
    %cst_16 = arith.constant 1.000000e+00 : f32
    %31 = vector.broadcast %cst_16 : f32 to vector<4x32xf32>
    %32 = arith.addf %31, %30 : vector<4x32xf32>
    %33 = arith.divf %31, %32 : vector<4x32xf32>
    %34 = math.tanh %28 : vector<4x32xf32>
    %35 = arith.mulf %33, %34 : vector<4x32xf32>
    %c1 = arith.constant 1 : index
    %c0_17 = arith.constant 0 : index
    %c0_18 = arith.constant 0 : index
    %36 = vector.load %arg0[%c1, %c0_17, %c0_18] : memref<8x4x128xf32, #tpu.memory_space<vmem>>, vector<1x4x128xf32>
    %37 = vector.shape_cast %36 : vector<1x4x128xf32> to vector<4x128xf32>
    %cst_19 = arith.constant dense<0.000000e+00> : vector<4x128xf32>
    %38 = tpu.matmul %35, %1, %cst_19 {dimension_numbers = #tpu.dot_dimension_numbers<[1], [0], [0], [1], [0, 0, 1, 1], [], []>} : vector<4x32xf32>, vector<32x128xf32>, vector<4x128xf32> -> vector<4x128xf32>
    %39 = arith.addf %37, %38 : vector<4x128xf32>
    %40 = vector.extract_strided_slice %39 {offsets = [0, 0], sizes = [4, 32], strides = [1, 1]} : vector<4x128xf32> to vector<4x32xf32>
    %41 = vector.extract_strided_slice %39 {offsets = [0, 32], sizes = [4, 32], strides = [1, 1]} : vector<4x128xf32> to vector<4x32xf32>
    %42 = vector.extract_strided_slice %39 {offsets = [0, 64], sizes = [4, 32], strides = [1, 1]} : vector<4x128xf32> to vector<4x32xf32>
    %43 = vector.extract_strided_slice %39 {offsets = [0, 96], sizes = [4, 32], strides = [1, 1]} : vector<4x128xf32> to vector<4x32xf32>
    %44 = arith.negf %40 : vector<4x32xf32>
    %45 = math.exp %44 : vector<4x32xf32>
    %cst_20 = arith.constant 1.000000e+00 : f32
    %46 = vector.broadcast %cst_20 : f32 to vector<4x32xf32>
    %47 = arith.addf %46, %45 : vector<4x32xf32>
    %48 = arith.divf %46, %47 : vector<4x32xf32>
    %49 = arith.mulf %48, %28 : vector<4x32xf32>
    %50 = arith.negf %42 : vector<4x32xf32>
    %51 = math.exp %50 : vector<4x32xf32>
    %cst_21 = arith.constant 1.000000e+00 : f32
    %52 = vector.broadcast %cst_21 : f32 to vector<4x32xf32>
    %53 = arith.addf %52, %51 : vector<4x32xf32>
    %54 = arith.divf %52, %53 : vector<4x32xf32>
    %55 = math.tanh %41 : vector<4x32xf32>
    %56 = arith.mulf %54, %55 : vector<4x32xf32>
    %57 = arith.addf %49, %56 : vector<4x32xf32>
    %58 = arith.negf %43 : vector<4x32xf32>
    %59 = math.exp %58 : vector<4x32xf32>
    %cst_22 = arith.constant 1.000000e+00 : f32
    %60 = vector.broadcast %cst_22 : f32 to vector<4x32xf32>
    %61 = arith.addf %60, %59 : vector<4x32xf32>
    %62 = arith.divf %60, %61 : vector<4x32xf32>
    %63 = math.tanh %57 : vector<4x32xf32>
    %64 = arith.mulf %62, %63 : vector<4x32xf32>
    %c2 = arith.constant 2 : index
    %c0_23 = arith.constant 0 : index
    %c0_24 = arith.constant 0 : index
    %65 = vector.load %arg0[%c2, %c0_23, %c0_24] : memref<8x4x128xf32, #tpu.memory_space<vmem>>, vector<1x4x128xf32>
    %66 = vector.shape_cast %65 : vector<1x4x128xf32> to vector<4x128xf32>
    %cst_25 = arith.constant dense<0.000000e+00> : vector<4x128xf32>
    %67 = tpu.matmul %64, %1, %cst_25 {dimension_numbers = #tpu.dot_dimension_numbers<[1], [0], [0], [1], [0, 0, 1, 1], [], []>} : vector<4x32xf32>, vector<32x128xf32>, vector<4x128xf32> -> vector<4x128xf32>
    %68 = arith.addf %66, %67 : vector<4x128xf32>
    %69 = vector.extract_strided_slice %68 {offsets = [0, 0], sizes = [4, 32], strides = [1, 1]} : vector<4x128xf32> to vector<4x32xf32>
    %70 = vector.extract_strided_slice %68 {offsets = [0, 32], sizes = [4, 32], strides = [1, 1]} : vector<4x128xf32> to vector<4x32xf32>
    %71 = vector.extract_strided_slice %68 {offsets = [0, 64], sizes = [4, 32], strides = [1, 1]} : vector<4x128xf32> to vector<4x32xf32>
    %72 = vector.extract_strided_slice %68 {offsets = [0, 96], sizes = [4, 32], strides = [1, 1]} : vector<4x128xf32> to vector<4x32xf32>
    %73 = arith.negf %69 : vector<4x32xf32>
    %74 = math.exp %73 : vector<4x32xf32>
    %cst_26 = arith.constant 1.000000e+00 : f32
    %75 = vector.broadcast %cst_26 : f32 to vector<4x32xf32>
    %76 = arith.addf %75, %74 : vector<4x32xf32>
    %77 = arith.divf %75, %76 : vector<4x32xf32>
    %78 = arith.mulf %77, %57 : vector<4x32xf32>
    %79 = arith.negf %71 : vector<4x32xf32>
    %80 = math.exp %79 : vector<4x32xf32>
    %cst_27 = arith.constant 1.000000e+00 : f32
    %81 = vector.broadcast %cst_27 : f32 to vector<4x32xf32>
    %82 = arith.addf %81, %80 : vector<4x32xf32>
    %83 = arith.divf %81, %82 : vector<4x32xf32>
    %84 = math.tanh %70 : vector<4x32xf32>
    %85 = arith.mulf %83, %84 : vector<4x32xf32>
    %86 = arith.addf %78, %85 : vector<4x32xf32>
    %87 = arith.negf %72 : vector<4x32xf32>
    %88 = math.exp %87 : vector<4x32xf32>
    %cst_28 = arith.constant 1.000000e+00 : f32
    %89 = vector.broadcast %cst_28 : f32 to vector<4x32xf32>
    %90 = arith.addf %89, %88 : vector<4x32xf32>
    %91 = arith.divf %89, %90 : vector<4x32xf32>
    %92 = math.tanh %86 : vector<4x32xf32>
    %93 = arith.mulf %91, %92 : vector<4x32xf32>
    %c3 = arith.constant 3 : index
    %c0_29 = arith.constant 0 : index
    %c0_30 = arith.constant 0 : index
    %94 = vector.load %arg0[%c3, %c0_29, %c0_30] : memref<8x4x128xf32, #tpu.memory_space<vmem>>, vector<1x4x128xf32>
    %95 = vector.shape_cast %94 : vector<1x4x128xf32> to vector<4x128xf32>
    %cst_31 = arith.constant dense<0.000000e+00> : vector<4x128xf32>
    %96 = tpu.matmul %93, %1, %cst_31 {dimension_numbers = #tpu.dot_dimension_numbers<[1], [0], [0], [1], [0, 0, 1, 1], [], []>} : vector<4x32xf32>, vector<32x128xf32>, vector<4x128xf32> -> vector<4x128xf32>
    %97 = arith.addf %95, %96 : vector<4x128xf32>
    %98 = vector.extract_strided_slice %97 {offsets = [0, 0], sizes = [4, 32], strides = [1, 1]} : vector<4x128xf32> to vector<4x32xf32>
    %99 = vector.extract_strided_slice %97 {offsets = [0, 32], sizes = [4, 32], strides = [1, 1]} : vector<4x128xf32> to vector<4x32xf32>
    %100 = vector.extract_strided_slice %97 {offsets = [0, 64], sizes = [4, 32], strides = [1, 1]} : vector<4x128xf32> to vector<4x32xf32>
    %101 = vector.extract_strided_slice %97 {offsets = [0, 96], sizes = [4, 32], strides = [1, 1]} : vector<4x128xf32> to vector<4x32xf32>
    %102 = arith.negf %98 : vector<4x32xf32>
    %103 = math.exp %102 : vector<4x32xf32>
    %cst_32 = arith.constant 1.000000e+00 : f32
    %104 = vector.broadcast %cst_32 : f32 to vector<4x32xf32>
    %105 = arith.addf %104, %103 : vector<4x32xf32>
    %106 = arith.divf %104, %105 : vector<4x32xf32>
    %107 = arith.mulf %106, %86 : vector<4x32xf32>
    %108 = arith.negf %100 : vector<4x32xf32>
    %109 = math.exp %108 : vector<4x32xf32>
    %cst_33 = arith.constant 1.000000e+00 : f32
    %110 = vector.broadcast %cst_33 : f32 to vector<4x32xf32>
    %111 = arith.addf %110, %109 : vector<4x32xf32>
    %112 = arith.divf %110, %111 : vector<4x32xf32>
    %113 = math.tanh %99 : vector<4x32xf32>
    %114 = arith.mulf %112, %113 : vector<4x32xf32>
    %115 = arith.addf %107, %114 : vector<4x32xf32>
    %116 = arith.negf %101 : vector<4x32xf32>
    %117 = math.exp %116 : vector<4x32xf32>
    %cst_34 = arith.constant 1.000000e+00 : f32
    %118 = vector.broadcast %cst_34 : f32 to vector<4x32xf32>
    %119 = arith.addf %118, %117 : vector<4x32xf32>
    %120 = arith.divf %118, %119 : vector<4x32xf32>
    %121 = math.tanh %115 : vector<4x32xf32>
    %122 = arith.mulf %120, %121 : vector<4x32xf32>
    %c4 = arith.constant 4 : index
    %c0_35 = arith.constant 0 : index
    %c0_36 = arith.constant 0 : index
    %123 = vector.load %arg0[%c4, %c0_35, %c0_36] : memref<8x4x128xf32, #tpu.memory_space<vmem>>, vector<1x4x128xf32>
    %124 = vector.shape_cast %123 : vector<1x4x128xf32> to vector<4x128xf32>
    %cst_37 = arith.constant dense<0.000000e+00> : vector<4x128xf32>
    %125 = tpu.matmul %122, %1, %cst_37 {dimension_numbers = #tpu.dot_dimension_numbers<[1], [0], [0], [1], [0, 0, 1, 1], [], []>} : vector<4x32xf32>, vector<32x128xf32>, vector<4x128xf32> -> vector<4x128xf32>
    %126 = arith.addf %124, %125 : vector<4x128xf32>
    %127 = vector.extract_strided_slice %126 {offsets = [0, 0], sizes = [4, 32], strides = [1, 1]} : vector<4x128xf32> to vector<4x32xf32>
    %128 = vector.extract_strided_slice %126 {offsets = [0, 32], sizes = [4, 32], strides = [1, 1]} : vector<4x128xf32> to vector<4x32xf32>
    %129 = vector.extract_strided_slice %126 {offsets = [0, 64], sizes = [4, 32], strides = [1, 1]} : vector<4x128xf32> to vector<4x32xf32>
    %130 = vector.extract_strided_slice %126 {offsets = [0, 96], sizes = [4, 32], strides = [1, 1]} : vector<4x128xf32> to vector<4x32xf32>
    %131 = arith.negf %127 : vector<4x32xf32>
    %132 = math.exp %131 : vector<4x32xf32>
    %cst_38 = arith.constant 1.000000e+00 : f32
    %133 = vector.broadcast %cst_38 : f32 to vector<4x32xf32>
    %134 = arith.addf %133, %132 : vector<4x32xf32>
    %135 = arith.divf %133, %134 : vector<4x32xf32>
    %136 = arith.mulf %135, %115 : vector<4x32xf32>
    %137 = arith.negf %129 : vector<4x32xf32>
    %138 = math.exp %137 : vector<4x32xf32>
    %cst_39 = arith.constant 1.000000e+00 : f32
    %139 = vector.broadcast %cst_39 : f32 to vector<4x32xf32>
    %140 = arith.addf %139, %138 : vector<4x32xf32>
    %141 = arith.divf %139, %140 : vector<4x32xf32>
    %142 = math.tanh %128 : vector<4x32xf32>
    %143 = arith.mulf %141, %142 : vector<4x32xf32>
    %144 = arith.addf %136, %143 : vector<4x32xf32>
    %145 = arith.negf %130 : vector<4x32xf32>
    %146 = math.exp %145 : vector<4x32xf32>
    %cst_40 = arith.constant 1.000000e+00 : f32
    %147 = vector.broadcast %cst_40 : f32 to vector<4x32xf32>
    %148 = arith.addf %147, %146 : vector<4x32xf32>
    %149 = arith.divf %147, %148 : vector<4x32xf32>
    %150 = math.tanh %144 : vector<4x32xf32>
    %151 = arith.mulf %149, %150 : vector<4x32xf32>
    %c5 = arith.constant 5 : index
    %c0_41 = arith.constant 0 : index
    %c0_42 = arith.constant 0 : index
    %152 = vector.load %arg0[%c5, %c0_41, %c0_42] : memref<8x4x128xf32, #tpu.memory_space<vmem>>, vector<1x4x128xf32>
    %153 = vector.shape_cast %152 : vector<1x4x128xf32> to vector<4x128xf32>
    %cst_43 = arith.constant dense<0.000000e+00> : vector<4x128xf32>
    %154 = tpu.matmul %151, %1, %cst_43 {dimension_numbers = #tpu.dot_dimension_numbers<[1], [0], [0], [1], [0, 0, 1, 1], [], []>} : vector<4x32xf32>, vector<32x128xf32>, vector<4x128xf32> -> vector<4x128xf32>
    %155 = arith.addf %153, %154 : vector<4x128xf32>
    %156 = vector.extract_strided_slice %155 {offsets = [0, 0], sizes = [4, 32], strides = [1, 1]} : vector<4x128xf32> to vector<4x32xf32>
    %157 = vector.extract_strided_slice %155 {offsets = [0, 32], sizes = [4, 32], strides = [1, 1]} : vector<4x128xf32> to vector<4x32xf32>
    %158 = vector.extract_strided_slice %155 {offsets = [0, 64], sizes = [4, 32], strides = [1, 1]} : vector<4x128xf32> to vector<4x32xf32>
    %159 = vector.extract_strided_slice %155 {offsets = [0, 96], sizes = [4, 32], strides = [1, 1]} : vector<4x128xf32> to vector<4x32xf32>
    %160 = arith.negf %156 : vector<4x32xf32>
    %161 = math.exp %160 : vector<4x32xf32>
    %cst_44 = arith.constant 1.000000e+00 : f32
    %162 = vector.broadcast %cst_44 : f32 to vector<4x32xf32>
    %163 = arith.addf %162, %161 : vector<4x32xf32>
    %164 = arith.divf %162, %163 : vector<4x32xf32>
    %165 = arith.mulf %164, %144 : vector<4x32xf32>
    %166 = arith.negf %158 : vector<4x32xf32>
    %167 = math.exp %166 : vector<4x32xf32>
    %cst_45 = arith.constant 1.000000e+00 : f32
    %168 = vector.broadcast %cst_45 : f32 to vector<4x32xf32>
    %169 = arith.addf %168, %167 : vector<4x32xf32>
    %170 = arith.divf %168, %169 : vector<4x32xf32>
    %171 = math.tanh %157 : vector<4x32xf32>
    %172 = arith.mulf %170, %171 : vector<4x32xf32>
    %173 = arith.addf %165, %172 : vector<4x32xf32>
    %174 = arith.negf %159 : vector<4x32xf32>
    %175 = math.exp %174 : vector<4x32xf32>
    %cst_46 = arith.constant 1.000000e+00 : f32
    %176 = vector.broadcast %cst_46 : f32 to vector<4x32xf32>
    %177 = arith.addf %176, %175 : vector<4x32xf32>
    %178 = arith.divf %176, %177 : vector<4x32xf32>
    %179 = math.tanh %173 : vector<4x32xf32>
    %180 = arith.mulf %178, %179 : vector<4x32xf32>
    %c6 = arith.constant 6 : index
    %c0_47 = arith.constant 0 : index
    %c0_48 = arith.constant 0 : index
    %181 = vector.load %arg0[%c6, %c0_47, %c0_48] : memref<8x4x128xf32, #tpu.memory_space<vmem>>, vector<1x4x128xf32>
    %182 = vector.shape_cast %181 : vector<1x4x128xf32> to vector<4x128xf32>
    %cst_49 = arith.constant dense<0.000000e+00> : vector<4x128xf32>
    %183 = tpu.matmul %180, %1, %cst_49 {dimension_numbers = #tpu.dot_dimension_numbers<[1], [0], [0], [1], [0, 0, 1, 1], [], []>} : vector<4x32xf32>, vector<32x128xf32>, vector<4x128xf32> -> vector<4x128xf32>
    %184 = arith.addf %182, %183 : vector<4x128xf32>
    %185 = vector.extract_strided_slice %184 {offsets = [0, 0], sizes = [4, 32], strides = [1, 1]} : vector<4x128xf32> to vector<4x32xf32>
    %186 = vector.extract_strided_slice %184 {offsets = [0, 32], sizes = [4, 32], strides = [1, 1]} : vector<4x128xf32> to vector<4x32xf32>
    %187 = vector.extract_strided_slice %184 {offsets = [0, 64], sizes = [4, 32], strides = [1, 1]} : vector<4x128xf32> to vector<4x32xf32>
    %188 = vector.extract_strided_slice %184 {offsets = [0, 96], sizes = [4, 32], strides = [1, 1]} : vector<4x128xf32> to vector<4x32xf32>
    %189 = arith.negf %185 : vector<4x32xf32>
    %190 = math.exp %189 : vector<4x32xf32>
    %cst_50 = arith.constant 1.000000e+00 : f32
    %191 = vector.broadcast %cst_50 : f32 to vector<4x32xf32>
    %192 = arith.addf %191, %190 : vector<4x32xf32>
    %193 = arith.divf %191, %192 : vector<4x32xf32>
    %194 = arith.mulf %193, %173 : vector<4x32xf32>
    %195 = arith.negf %187 : vector<4x32xf32>
    %196 = math.exp %195 : vector<4x32xf32>
    %cst_51 = arith.constant 1.000000e+00 : f32
    %197 = vector.broadcast %cst_51 : f32 to vector<4x32xf32>
    %198 = arith.addf %197, %196 : vector<4x32xf32>
    %199 = arith.divf %197, %198 : vector<4x32xf32>
    %200 = math.tanh %186 : vector<4x32xf32>
    %201 = arith.mulf %199, %200 : vector<4x32xf32>
    %202 = arith.addf %194, %201 : vector<4x32xf32>
    %203 = arith.negf %188 : vector<4x32xf32>
    %204 = math.exp %203 : vector<4x32xf32>
    %cst_52 = arith.constant 1.000000e+00 : f32
    %205 = vector.broadcast %cst_52 : f32 to vector<4x32xf32>
    %206 = arith.addf %205, %204 : vector<4x32xf32>
    %207 = arith.divf %205, %206 : vector<4x32xf32>
    %208 = math.tanh %202 : vector<4x32xf32>
    %209 = arith.mulf %207, %208 : vector<4x32xf32>
    %c7 = arith.constant 7 : index
    %c0_53 = arith.constant 0 : index
    %c0_54 = arith.constant 0 : index
    %210 = vector.load %arg0[%c7, %c0_53, %c0_54] : memref<8x4x128xf32, #tpu.memory_space<vmem>>, vector<1x4x128xf32>
    %211 = vector.shape_cast %210 : vector<1x4x128xf32> to vector<4x128xf32>
    %cst_55 = arith.constant dense<0.000000e+00> : vector<4x128xf32>
    %212 = tpu.matmul %209, %1, %cst_55 {dimension_numbers = #tpu.dot_dimension_numbers<[1], [0], [0], [1], [0, 0, 1, 1], [], []>} : vector<4x32xf32>, vector<32x128xf32>, vector<4x128xf32> -> vector<4x128xf32>
    %213 = arith.addf %211, %212 : vector<4x128xf32>
    %214 = vector.extract_strided_slice %213 {offsets = [0, 0], sizes = [4, 32], strides = [1, 1]} : vector<4x128xf32> to vector<4x32xf32>
    %215 = vector.extract_strided_slice %213 {offsets = [0, 32], sizes = [4, 32], strides = [1, 1]} : vector<4x128xf32> to vector<4x32xf32>
    %216 = vector.extract_strided_slice %213 {offsets = [0, 64], sizes = [4, 32], strides = [1, 1]} : vector<4x128xf32> to vector<4x32xf32>
    %217 = vector.extract_strided_slice %213 {offsets = [0, 96], sizes = [4, 32], strides = [1, 1]} : vector<4x128xf32> to vector<4x32xf32>
    %218 = arith.negf %214 : vector<4x32xf32>
    %219 = math.exp %218 : vector<4x32xf32>
    %cst_56 = arith.constant 1.000000e+00 : f32
    %220 = vector.broadcast %cst_56 : f32 to vector<4x32xf32>
    %221 = arith.addf %220, %219 : vector<4x32xf32>
    %222 = arith.divf %220, %221 : vector<4x32xf32>
    %223 = arith.mulf %222, %202 : vector<4x32xf32>
    %224 = arith.negf %216 : vector<4x32xf32>
    %225 = math.exp %224 : vector<4x32xf32>
    %cst_57 = arith.constant 1.000000e+00 : f32
    %226 = vector.broadcast %cst_57 : f32 to vector<4x32xf32>
    %227 = arith.addf %226, %225 : vector<4x32xf32>
    %228 = arith.divf %226, %227 : vector<4x32xf32>
    %229 = math.tanh %215 : vector<4x32xf32>
    %230 = arith.mulf %228, %229 : vector<4x32xf32>
    %231 = arith.addf %223, %230 : vector<4x32xf32>
    %232 = arith.negf %217 : vector<4x32xf32>
    %233 = math.exp %232 : vector<4x32xf32>
    %cst_58 = arith.constant 1.000000e+00 : f32
    %234 = vector.broadcast %cst_58 : f32 to vector<4x32xf32>
    %235 = arith.addf %234, %233 : vector<4x32xf32>
    %236 = arith.divf %234, %235 : vector<4x32xf32>
    %237 = math.tanh %231 : vector<4x32xf32>
    %238 = arith.mulf %236, %237 : vector<4x32xf32>
    %c0_59 = arith.constant 0 : index
    %c0_60 = arith.constant 0 : index
    %c0_61 = arith.constant 0 : index
    %239 = vector.load %arg9[%c0_59, %c0_60, %c0_61] : memref<2x4x32xf32, #tpu.memory_space<vmem>>, vector<1x4x32xf32>
    %240 = vector.shape_cast %239 : vector<1x4x32xf32> to vector<4x32xf32>
    %241 = vector.shape_cast %238 : vector<4x32xf32> to vector<1x4x32xf32>
    tpu.vector_store %arg9[%c0_59, %c0_60, %c0_61], %241 {strides = array<i32>} : memref<2x4x32xf32, #tpu.memory_space<vmem>>, vector<1x4x32xf32>,
    %c0_62 = arith.constant 0 : index
    %c0_63 = arith.constant 0 : index
    %c0_64 = arith.constant 0 : index
    %242 = vector.load %arg10[%c0_62, %c0_63, %c0_64] : memref<2x4x32xf32, #tpu.memory_space<vmem>>, vector<1x4x32xf32>
    %243 = vector.shape_cast %242 : vector<1x4x32xf32> to vector<4x32xf32>
    %244 = vector.shape_cast %231 : vector<4x32xf32> to vector<1x4x32xf32>
    tpu.vector_store %arg10[%c0_62, %c0_63, %c0_64], %244 {strides = array<i32>} : memref<2x4x32xf32, #tpu.memory_space<vmem>>, vector<1x4x32xf32>,
    %c1_65 = arith.constant 1 : index
    %c0_66 = arith.constant 0 : index
    %c0_67 = arith.constant 0 : index
    %245 = vector.load %arg6[%c1_65, %c0_66, %c0_67] : memref<2x4x32xf32, #tpu.memory_space<vmem>>, vector<1x4x32xf32>
    %246 = vector.shape_cast %245 : vector<1x4x32xf32> to vector<4x32xf32>
    %c1_68 = arith.constant 1 : index
    %c0_69 = arith.constant 0 : index
    %c0_70 = arith.constant 0 : index
    %247 = vector.load %arg7[%c1_68, %c0_69, %c0_70] : memref<2x4x32xf32, #tpu.memory_space<vmem>>, vector<1x4x32xf32>
    %248 = vector.shape_cast %247 : vector<1x4x32xf32> to vector<4x32xf32>
    %cst_71 = arith.constant dense<0.000000e+00> : vector<4x128xf32>
    %249 = tpu.matmul %35, %0, %cst_71 {dimension_numbers = #tpu.dot_dimension_numbers<[1], [0], [0], [1], [0, 0, 1, 1], [], []>} : vector<4x32xf32>, vector<32x128xf32>, vector<4x128xf32> -> vector<4x128xf32>
    %250 = vector.broadcast %2 : vector<1x128xf32> to vector<4x128xf32>
    %251 = arith.addf %249, %250 : vector<4x128xf32>
    %cst_72 = arith.constant dense<0.000000e+00> : vector<4x128xf32>
    %252 = tpu.matmul %246, %1, %cst_72 {dimension_numbers = #tpu.dot_dimension_numbers<[1], [0], [0], [1], [0, 0, 1, 1], [], []>} : vector<4x32xf32>, vector<32x128xf32>, vector<4x128xf32> -> vector<4x128xf32>
    %253 = arith.addf %251, %252 : vector<4x128xf32>
    %254 = vector.extract_strided_slice %253 {offsets = [0, 0], sizes = [4, 32], strides = [1, 1]} : vector<4x128xf32> to vector<4x32xf32>
    %255 = vector.extract_strided_slice %253 {offsets = [0, 32], sizes = [4, 32], strides = [1, 1]} : vector<4x128xf32> to vector<4x32xf32>
    %256 = vector.extract_strided_slice %253 {offsets = [0, 64], sizes = [4, 32], strides = [1, 1]} : vector<4x128xf32> to vector<4x32xf32>
    %257 = vector.extract_strided_slice %253 {offsets = [0, 96], sizes = [4, 32], strides = [1, 1]} : vector<4x128xf32> to vector<4x32xf32>
    %258 = arith.negf %254 : vector<4x32xf32>
    %259 = math.exp %258 : vector<4x32xf32>
    %cst_73 = arith.constant 1.000000e+00 : f32
    %260 = vector.broadcast %cst_73 : f32 to vector<4x32xf32>
    %261 = arith.addf %260, %259 : vector<4x32xf32>
    %262 = arith.divf %260, %261 : vector<4x32xf32>
    %263 = arith.mulf %262, %248 : vector<4x32xf32>
    %264 = arith.negf %256 : vector<4x32xf32>
    %265 = math.exp %264 : vector<4x32xf32>
    %cst_74 = arith.constant 1.000000e+00 : f32
    %266 = vector.broadcast %cst_74 : f32 to vector<4x32xf32>
    %267 = arith.addf %266, %265 : vector<4x32xf32>
    %268 = arith.divf %266, %267 : vector<4x32xf32>
    %269 = math.tanh %255 : vector<4x32xf32>
    %270 = arith.mulf %268, %269 : vector<4x32xf32>
    %271 = arith.addf %263, %270 : vector<4x32xf32>
    %272 = arith.negf %257 : vector<4x32xf32>
    %273 = math.exp %272 : vector<4x32xf32>
    %cst_75 = arith.constant 1.000000e+00 : f32
    %274 = vector.broadcast %cst_75 : f32 to vector<4x32xf32>
    %275 = arith.addf %274, %273 : vector<4x32xf32>
    %276 = arith.divf %274, %275 : vector<4x32xf32>
    %277 = math.tanh %271 : vector<4x32xf32>
    %278 = arith.mulf %276, %277 : vector<4x32xf32>
    %cst_76 = arith.constant dense<0.000000e+00> : vector<4x128xf32>
    %279 = tpu.matmul %64, %0, %cst_76 {dimension_numbers = #tpu.dot_dimension_numbers<[1], [0], [0], [1], [0, 0, 1, 1], [], []>} : vector<4x32xf32>, vector<32x128xf32>, vector<4x128xf32> -> vector<4x128xf32>
    %280 = vector.broadcast %2 : vector<1x128xf32> to vector<4x128xf32>
    %281 = arith.addf %279, %280 : vector<4x128xf32>
    %cst_77 = arith.constant dense<0.000000e+00> : vector<4x128xf32>
    %282 = tpu.matmul %278, %1, %cst_77 {dimension_numbers = #tpu.dot_dimension_numbers<[1], [0], [0], [1], [0, 0, 1, 1], [], []>} : vector<4x32xf32>, vector<32x128xf32>, vector<4x128xf32> -> vector<4x128xf32>
    %283 = arith.addf %281, %282 : vector<4x128xf32>
    %284 = vector.extract_strided_slice %283 {offsets = [0, 0], sizes = [4, 32], strides = [1, 1]} : vector<4x128xf32> to vector<4x32xf32>
    %285 = vector.extract_strided_slice %283 {offsets = [0, 32], sizes = [4, 32], strides = [1, 1]} : vector<4x128xf32> to vector<4x32xf32>
    %286 = vector.extract_strided_slice %283 {offsets = [0, 64], sizes = [4, 32], strides = [1, 1]} : vector<4x128xf32> to vector<4x32xf32>
    %287 = vector.extract_strided_slice %283 {offsets = [0, 96], sizes = [4, 32], strides = [1, 1]} : vector<4x128xf32> to vector<4x32xf32>
    %288 = arith.negf %284 : vector<4x32xf32>
    %289 = math.exp %288 : vector<4x32xf32>
    %cst_78 = arith.constant 1.000000e+00 : f32
    %290 = vector.broadcast %cst_78 : f32 to vector<4x32xf32>
    %291 = arith.addf %290, %289 : vector<4x32xf32>
    %292 = arith.divf %290, %291 : vector<4x32xf32>
    %293 = arith.mulf %292, %271 : vector<4x32xf32>
    %294 = arith.negf %286 : vector<4x32xf32>
    %295 = math.exp %294 : vector<4x32xf32>
    %cst_79 = arith.constant 1.000000e+00 : f32
    %296 = vector.broadcast %cst_79 : f32 to vector<4x32xf32>
    %297 = arith.addf %296, %295 : vector<4x32xf32>
    %298 = arith.divf %296, %297 : vector<4x32xf32>
    %299 = math.tanh %285 : vector<4x32xf32>
    %300 = arith.mulf %298, %299 : vector<4x32xf32>
    %301 = arith.addf %293, %300 : vector<4x32xf32>
    %302 = arith.negf %287 : vector<4x32xf32>
    %303 = math.exp %302 : vector<4x32xf32>
    %cst_80 = arith.constant 1.000000e+00 : f32
    %304 = vector.broadcast %cst_80 : f32 to vector<4x32xf32>
    %305 = arith.addf %304, %303 : vector<4x32xf32>
    %306 = arith.divf %304, %305 : vector<4x32xf32>
    %307 = math.tanh %301 : vector<4x32xf32>
    %308 = arith.mulf %306, %307 : vector<4x32xf32>
    %cst_81 = arith.constant dense<0.000000e+00> : vector<4x128xf32>
    %309 = tpu.matmul %93, %0, %cst_81 {dimension_numbers = #tpu.dot_dimension_numbers<[1], [0], [0], [1], [0, 0, 1, 1], [], []>} : vector<4x32xf32>, vector<32x128xf32>, vector<4x128xf32> -> vector<4x128xf32>
    %310 = vector.broadcast %2 : vector<1x128xf32> to vector<4x128xf32>
    %311 = arith.addf %309, %310 : vector<4x128xf32>
    %cst_82 = arith.constant dense<0.000000e+00> : vector<4x128xf32>
    %312 = tpu.matmul %308, %1, %cst_82 {dimension_numbers = #tpu.dot_dimension_numbers<[1], [0], [0], [1], [0, 0, 1, 1], [], []>} : vector<4x32xf32>, vector<32x128xf32>, vector<4x128xf32> -> vector<4x128xf32>
    %313 = arith.addf %311, %312 : vector<4x128xf32>
    %314 = vector.extract_strided_slice %313 {offsets = [0, 0], sizes = [4, 32], strides = [1, 1]} : vector<4x128xf32> to vector<4x32xf32>
    %315 = vector.extract_strided_slice %313 {offsets = [0, 32], sizes = [4, 32], strides = [1, 1]} : vector<4x128xf32> to vector<4x32xf32>
    %316 = vector.extract_strided_slice %313 {offsets = [0, 64], sizes = [4, 32], strides = [1, 1]} : vector<4x128xf32> to vector<4x32xf32>
    %317 = vector.extract_strided_slice %313 {offsets = [0, 96], sizes = [4, 32], strides = [1, 1]} : vector<4x128xf32> to vector<4x32xf32>
    %318 = arith.negf %314 : vector<4x32xf32>
    %319 = math.exp %318 : vector<4x32xf32>
    %cst_83 = arith.constant 1.000000e+00 : f32
    %320 = vector.broadcast %cst_83 : f32 to vector<4x32xf32>
    %321 = arith.addf %320, %319 : vector<4x32xf32>
    %322 = arith.divf %320, %321 : vector<4x32xf32>
    %323 = arith.mulf %322, %301 : vector<4x32xf32>
    %324 = arith.negf %316 : vector<4x32xf32>
    %325 = math.exp %324 : vector<4x32xf32>
    %cst_84 = arith.constant 1.000000e+00 : f32
    %326 = vector.broadcast %cst_84 : f32 to vector<4x32xf32>
    %327 = arith.addf %326, %325 : vector<4x32xf32>
    %328 = arith.divf %326, %327 : vector<4x32xf32>
    %329 = math.tanh %315 : vector<4x32xf32>
    %330 = arith.mulf %328, %329 : vector<4x32xf32>
    %331 = arith.addf %323, %330 : vector<4x32xf32>
    %332 = arith.negf %317 : vector<4x32xf32>
    %333 = math.exp %332 : vector<4x32xf32>
    %cst_85 = arith.constant 1.000000e+00 : f32
    %334 = vector.broadcast %cst_85 : f32 to vector<4x32xf32>
    %335 = arith.addf %334, %333 : vector<4x32xf32>
    %336 = arith.divf %334, %335 : vector<4x32xf32>
    %337 = math.tanh %331 : vector<4x32xf32>
    %338 = arith.mulf %336, %337 : vector<4x32xf32>
    %cst_86 = arith.constant dense<0.000000e+00> : vector<4x128xf32>
    %339 = tpu.matmul %122, %0, %cst_86 {dimension_numbers = #tpu.dot_dimension_numbers<[1], [0], [0], [1], [0, 0, 1, 1], [], []>} : vector<4x32xf32>, vector<32x128xf32>, vector<4x128xf32> -> vector<4x128xf32>
    %340 = vector.broadcast %2 : vector<1x128xf32> to vector<4x128xf32>
    %341 = arith.addf %339, %340 : vector<4x128xf32>
    %cst_87 = arith.constant dense<0.000000e+00> : vector<4x128xf32>
    %342 = tpu.matmul %338, %1, %cst_87 {dimension_numbers = #tpu.dot_dimension_numbers<[1], [0], [0], [1], [0, 0, 1, 1], [], []>} : vector<4x32xf32>, vector<32x128xf32>, vector<4x128xf32> -> vector<4x128xf32>
    %343 = arith.addf %341, %342 : vector<4x128xf32>
    %344 = vector.extract_strided_slice %343 {offsets = [0, 0], sizes = [4, 32], strides = [1, 1]} : vector<4x128xf32> to vector<4x32xf32>
    %345 = vector.extract_strided_slice %343 {offsets = [0, 32], sizes = [4, 32], strides = [1, 1]} : vector<4x128xf32> to vector<4x32xf32>
    %346 = vector.extract_strided_slice %343 {offsets = [0, 64], sizes = [4, 32], strides = [1, 1]} : vector<4x128xf32> to vector<4x32xf32>
    %347 = vector.extract_strided_slice %343 {offsets = [0, 96], sizes = [4, 32], strides = [1, 1]} : vector<4x128xf32> to vector<4x32xf32>
    %348 = arith.negf %344 : vector<4x32xf32>
    %349 = math.exp %348 : vector<4x32xf32>
    %cst_88 = arith.constant 1.000000e+00 : f32
    %350 = vector.broadcast %cst_88 : f32 to vector<4x32xf32>
    %351 = arith.addf %350, %349 : vector<4x32xf32>
    %352 = arith.divf %350, %351 : vector<4x32xf32>
    %353 = arith.mulf %352, %331 : vector<4x32xf32>
    %354 = arith.negf %346 : vector<4x32xf32>
    %355 = math.exp %354 : vector<4x32xf32>
    %cst_89 = arith.constant 1.000000e+00 : f32
    %356 = vector.broadcast %cst_89 : f32 to vector<4x32xf32>
    %357 = arith.addf %356, %355 : vector<4x32xf32>
    %358 = arith.divf %356, %357 : vector<4x32xf32>
    %359 = math.tanh %345 : vector<4x32xf32>
    %360 = arith.mulf %358, %359 : vector<4x32xf32>
    %361 = arith.addf %353, %360 : vector<4x32xf32>
    %362 = arith.negf %347 : vector<4x32xf32>
    %363 = math.exp %362 : vector<4x32xf32>
    %cst_90 = arith.constant 1.000000e+00 : f32
    %364 = vector.broadcast %cst_90 : f32 to vector<4x32xf32>
    %365 = arith.addf %364, %363 : vector<4x32xf32>
    %366 = arith.divf %364, %365 : vector<4x32xf32>
    %367 = math.tanh %361 : vector<4x32xf32>
    %368 = arith.mulf %366, %367 : vector<4x32xf32>
    %cst_91 = arith.constant dense<0.000000e+00> : vector<4x128xf32>
    %369 = tpu.matmul %151, %0, %cst_91 {dimension_numbers = #tpu.dot_dimension_numbers<[1], [0], [0], [1], [0, 0, 1, 1], [], []>} : vector<4x32xf32>, vector<32x128xf32>, vector<4x128xf32> -> vector<4x128xf32>
    %370 = vector.broadcast %2 : vector<1x128xf32> to vector<4x128xf32>
    %371 = arith.addf %369, %370 : vector<4x128xf32>
    %cst_92 = arith.constant dense<0.000000e+00> : vector<4x128xf32>
    %372 = tpu.matmul %368, %1, %cst_92 {dimension_numbers = #tpu.dot_dimension_numbers<[1], [0], [0], [1], [0, 0, 1, 1], [], []>} : vector<4x32xf32>, vector<32x128xf32>, vector<4x128xf32> -> vector<4x128xf32>
    %373 = arith.addf %371, %372 : vector<4x128xf32>
    %374 = vector.extract_strided_slice %373 {offsets = [0, 0], sizes = [4, 32], strides = [1, 1]} : vector<4x128xf32> to vector<4x32xf32>
    %375 = vector.extract_strided_slice %373 {offsets = [0, 32], sizes = [4, 32], strides = [1, 1]} : vector<4x128xf32> to vector<4x32xf32>
    %376 = vector.extract_strided_slice %373 {offsets = [0, 64], sizes = [4, 32], strides = [1, 1]} : vector<4x128xf32> to vector<4x32xf32>
    %377 = vector.extract_strided_slice %373 {offsets = [0, 96], sizes = [4, 32], strides = [1, 1]} : vector<4x128xf32> to vector<4x32xf32>
    %378 = arith.negf %374 : vector<4x32xf32>
    %379 = math.exp %378 : vector<4x32xf32>
    %cst_93 = arith.constant 1.000000e+00 : f32
    %380 = vector.broadcast %cst_93 : f32 to vector<4x32xf32>
    %381 = arith.addf %380, %379 : vector<4x32xf32>
    %382 = arith.divf %380, %381 : vector<4x32xf32>
    %383 = arith.mulf %382, %361 : vector<4x32xf32>
    %384 = arith.negf %376 : vector<4x32xf32>
    %385 = math.exp %384 : vector<4x32xf32>
    %cst_94 = arith.constant 1.000000e+00 : f32
    %386 = vector.broadcast %cst_94 : f32 to vector<4x32xf32>
    %387 = arith.addf %386, %385 : vector<4x32xf32>
    %388 = arith.divf %386, %387 : vector<4x32xf32>
    %389 = math.tanh %375 : vector<4x32xf32>
    %390 = arith.mulf %388, %389 : vector<4x32xf32>
    %391 = arith.addf %383, %390 : vector<4x32xf32>
    %392 = arith.negf %377 : vector<4x32xf32>
    %393 = math.exp %392 : vector<4x32xf32>
    %cst_95 = arith.constant 1.000000e+00 : f32
    %394 = vector.broadcast %cst_95 : f32 to vector<4x32xf32>
    %395 = arith.addf %394, %393 : vector<4x32xf32>
    %396 = arith.divf %394, %395 : vector<4x32xf32>
    %397 = math.tanh %391 : vector<4x32xf32>
    %398 = arith.mulf %396, %397 : vector<4x32xf32>
    %cst_96 = arith.constant dense<0.000000e+00> : vector<4x128xf32>
    %399 = tpu.matmul %180, %0, %cst_96 {dimension_numbers = #tpu.dot_dimension_numbers<[1], [0], [0], [1], [0, 0, 1, 1], [], []>} : vector<4x32xf32>, vector<32x128xf32>, vector<4x128xf32> -> vector<4x128xf32>
    %400 = vector.broadcast %2 : vector<1x128xf32> to vector<4x128xf32>
    %401 = arith.addf %399, %400 : vector<4x128xf32>
    %cst_97 = arith.constant dense<0.000000e+00> : vector<4x128xf32>
    %402 = tpu.matmul %398, %1, %cst_97 {dimension_numbers = #tpu.dot_dimension_numbers<[1], [0], [0], [1], [0, 0, 1, 1], [], []>} : vector<4x32xf32>, vector<32x128xf32>, vector<4x128xf32> -> vector<4x128xf32>
    %403 = arith.addf %401, %402 : vector<4x128xf32>
    %404 = vector.extract_strided_slice %403 {offsets = [0, 0], sizes = [4, 32], strides = [1, 1]} : vector<4x128xf32> to vector<4x32xf32>
    %405 = vector.extract_strided_slice %403 {offsets = [0, 32], sizes = [4, 32], strides = [1, 1]} : vector<4x128xf32> to vector<4x32xf32>
    %406 = vector.extract_strided_slice %403 {offsets = [0, 64], sizes = [4, 32], strides = [1, 1]} : vector<4x128xf32> to vector<4x32xf32>
    %407 = vector.extract_strided_slice %403 {offsets = [0, 96], sizes = [4, 32], strides = [1, 1]} : vector<4x128xf32> to vector<4x32xf32>
    %408 = arith.negf %404 : vector<4x32xf32>
    %409 = math.exp %408 : vector<4x32xf32>
    %cst_98 = arith.constant 1.000000e+00 : f32
    %410 = vector.broadcast %cst_98 : f32 to vector<4x32xf32>
    %411 = arith.addf %410, %409 : vector<4x32xf32>
    %412 = arith.divf %410, %411 : vector<4x32xf32>
    %413 = arith.mulf %412, %391 : vector<4x32xf32>
    %414 = arith.negf %406 : vector<4x32xf32>
    %415 = math.exp %414 : vector<4x32xf32>
    %cst_99 = arith.constant 1.000000e+00 : f32
    %416 = vector.broadcast %cst_99 : f32 to vector<4x32xf32>
    %417 = arith.addf %416, %415 : vector<4x32xf32>
    %418 = arith.divf %416, %417 : vector<4x32xf32>
    %419 = math.tanh %405 : vector<4x32xf32>
    %420 = arith.mulf %418, %419 : vector<4x32xf32>
    %421 = arith.addf %413, %420 : vector<4x32xf32>
    %422 = arith.negf %407 : vector<4x32xf32>
    %423 = math.exp %422 : vector<4x32xf32>
    %cst_100 = arith.constant 1.000000e+00 : f32
    %424 = vector.broadcast %cst_100 : f32 to vector<4x32xf32>
    %425 = arith.addf %424, %423 : vector<4x32xf32>
    %426 = arith.divf %424, %425 : vector<4x32xf32>
    %427 = math.tanh %421 : vector<4x32xf32>
    %428 = arith.mulf %426, %427 : vector<4x32xf32>
    %cst_101 = arith.constant dense<0.000000e+00> : vector<4x128xf32>
    %429 = tpu.matmul %209, %0, %cst_101 {dimension_numbers = #tpu.dot_dimension_numbers<[1], [0], [0], [1], [0, 0, 1, 1], [], []>} : vector<4x32xf32>, vector<32x128xf32>, vector<4x128xf32> -> vector<4x128xf32>
    %430 = vector.broadcast %2 : vector<1x128xf32> to vector<4x128xf32>
    %431 = arith.addf %429, %430 : vector<4x128xf32>
    %cst_102 = arith.constant dense<0.000000e+00> : vector<4x128xf32>
    %432 = tpu.matmul %428, %1, %cst_102 {dimension_numbers = #tpu.dot_dimension_numbers<[1], [0], [0], [1], [0, 0, 1, 1], [], []>} : vector<4x32xf32>, vector<32x128xf32>, vector<4x128xf32> -> vector<4x128xf32>
    %433 = arith.addf %431, %432 : vector<4x128xf32>
    %434 = vector.extract_strided_slice %433 {offsets = [0, 0], sizes = [4, 32], strides = [1, 1]} : vector<4x128xf32> to vector<4x32xf32>
    %435 = vector.extract_strided_slice %433 {offsets = [0, 32], sizes = [4, 32], strides = [1, 1]} : vector<4x128xf32> to vector<4x32xf32>
    %436 = vector.extract_strided_slice %433 {offsets = [0, 64], sizes = [4, 32], strides = [1, 1]} : vector<4x128xf32> to vector<4x32xf32>
    %437 = vector.extract_strided_slice %433 {offsets = [0, 96], sizes = [4, 32], strides = [1, 1]} : vector<4x128xf32> to vector<4x32xf32>
    %438 = arith.negf %434 : vector<4x32xf32>
    %439 = math.exp %438 : vector<4x32xf32>
    %cst_103 = arith.constant 1.000000e+00 : f32
    %440 = vector.broadcast %cst_103 : f32 to vector<4x32xf32>
    %441 = arith.addf %440, %439 : vector<4x32xf32>
    %442 = arith.divf %440, %441 : vector<4x32xf32>
    %443 = arith.mulf %442, %421 : vector<4x32xf32>
    %444 = arith.negf %436 : vector<4x32xf32>
    %445 = math.exp %444 : vector<4x32xf32>
    %cst_104 = arith.constant 1.000000e+00 : f32
    %446 = vector.broadcast %cst_104 : f32 to vector<4x32xf32>
    %447 = arith.addf %446, %445 : vector<4x32xf32>
    %448 = arith.divf %446, %447 : vector<4x32xf32>
    %449 = math.tanh %435 : vector<4x32xf32>
    %450 = arith.mulf %448, %449 : vector<4x32xf32>
    %451 = arith.addf %443, %450 : vector<4x32xf32>
    %452 = arith.negf %437 : vector<4x32xf32>
    %453 = math.exp %452 : vector<4x32xf32>
    %cst_105 = arith.constant 1.000000e+00 : f32
    %454 = vector.broadcast %cst_105 : f32 to vector<4x32xf32>
    %455 = arith.addf %454, %453 : vector<4x32xf32>
    %456 = arith.divf %454, %455 : vector<4x32xf32>
    %457 = math.tanh %451 : vector<4x32xf32>
    %458 = arith.mulf %456, %457 : vector<4x32xf32>
    %cst_106 = arith.constant dense<0.000000e+00> : vector<4x128xf32>
    %459 = tpu.matmul %238, %0, %cst_106 {dimension_numbers = #tpu.dot_dimension_numbers<[1], [0], [0], [1], [0, 0, 1, 1], [], []>} : vector<4x32xf32>, vector<32x128xf32>, vector<4x128xf32> -> vector<4x128xf32>
    %460 = vector.broadcast %2 : vector<1x128xf32> to vector<4x128xf32>
    %461 = arith.addf %459, %460 : vector<4x128xf32>
    %cst_107 = arith.constant dense<0.000000e+00> : vector<4x128xf32>
    %462 = tpu.matmul %458, %1, %cst_107 {dimension_numbers = #tpu.dot_dimension_numbers<[1], [0], [0], [1], [0, 0, 1, 1], [], []>} : vector<4x32xf32>, vector<32x128xf32>, vector<4x128xf32> -> vector<4x128xf32>
    %463 = arith.addf %461, %462 : vector<4x128xf32>
    %464 = vector.extract_strided_slice %463 {offsets = [0, 0], sizes = [4, 32], strides = [1, 1]} : vector<4x128xf32> to vector<4x32xf32>
    %465 = vector.extract_strided_slice %463 {offsets = [0, 32], sizes = [4, 32], strides = [1, 1]} : vector<4x128xf32> to vector<4x32xf32>
    %466 = vector.extract_strided_slice %463 {offsets = [0, 64], sizes = [4, 32], strides = [1, 1]} : vector<4x128xf32> to vector<4x32xf32>
    %467 = vector.extract_strided_slice %463 {offsets = [0, 96], sizes = [4, 32], strides = [1, 1]} : vector<4x128xf32> to vector<4x32xf32>
    %468 = arith.negf %464 : vector<4x32xf32>
    %469 = math.exp %468 : vector<4x32xf32>
    %cst_108 = arith.constant 1.000000e+00 : f32
    %470 = vector.broadcast %cst_108 : f32 to vector<4x32xf32>
    %471 = arith.addf %470, %469 : vector<4x32xf32>
    %472 = arith.divf %470, %471 : vector<4x32xf32>
    %473 = arith.mulf %472, %451 : vector<4x32xf32>
    %474 = arith.negf %466 : vector<4x32xf32>
    %475 = math.exp %474 : vector<4x32xf32>
    %cst_109 = arith.constant 1.000000e+00 : f32
    %476 = vector.broadcast %cst_109 : f32 to vector<4x32xf32>
    %477 = arith.addf %476, %475 : vector<4x32xf32>
    %478 = arith.divf %476, %477 : vector<4x32xf32>
    %479 = math.tanh %465 : vector<4x32xf32>
    %480 = arith.mulf %478, %479 : vector<4x32xf32>
    %481 = arith.addf %473, %480 : vector<4x32xf32>
    %482 = arith.negf %467 : vector<4x32xf32>
    %483 = math.exp %482 : vector<4x32xf32>
    %cst_110 = arith.constant 1.000000e+00 : f32
    %484 = vector.broadcast %cst_110 : f32 to vector<4x32xf32>
    %485 = arith.addf %484, %483 : vector<4x32xf32>
    %486 = arith.divf %484, %485 : vector<4x32xf32>
    %487 = math.tanh %481 : vector<4x32xf32>
    %488 = arith.mulf %486, %487 : vector<4x32xf32>
    %c1_111 = arith.constant 1 : index
    %c0_112 = arith.constant 0 : index
    %c0_113 = arith.constant 0 : index
    %489 = vector.load %arg9[%c1_111, %c0_112, %c0_113] : memref<2x4x32xf32, #tpu.memory_space<vmem>>, vector<1x4x32xf32>
    %490 = vector.shape_cast %489 : vector<1x4x32xf32> to vector<4x32xf32>
    %491 = vector.shape_cast %488 : vector<4x32xf32> to vector<1x4x32xf32>
    tpu.vector_store %arg9[%c1_111, %c0_112, %c0_113], %491 {strides = array<i32>} : memref<2x4x32xf32, #tpu.memory_space<vmem>>, vector<1x4x32xf32>,
    %c1_114 = arith.constant 1 : index
    %c0_115 = arith.constant 0 : index
    %c0_116 = arith.constant 0 : index
    %492 = vector.load %arg10[%c1_114, %c0_115, %c0_116] : memref<2x4x32xf32, #tpu.memory_space<vmem>>, vector<1x4x32xf32>
    %493 = vector.shape_cast %492 : vector<1x4x32xf32> to vector<4x32xf32>
    %494 = vector.shape_cast %481 : vector<4x32xf32> to vector<1x4x32xf32>
    tpu.vector_store %arg10[%c1_114, %c0_115, %c0_116], %494 {strides = array<i32>} : memref<2x4x32xf32, #tpu.memory_space<vmem>>, vector<1x4x32xf32>,
    %c0_117 = arith.constant 0 : index
    %c0_118 = arith.constant 0 : index
    %495 = vector.load %arg4[%c0_117, %c0_118] : memref<32x3xf32, #tpu.memory_space<vmem>>, vector<32x3xf32>
    %c0_119 = arith.constant 0 : index
    %c0_120 = arith.constant 0 : index
    %496 = vector.load %arg5[%c0_119, %c0_120] : memref<1x3xf32, #tpu.memory_space<vmem>>, vector<1x3xf32>
    %cst_121 = arith.constant dense<0.000000e+00> : vector<4x3xf32>
    %497 = tpu.matmul %278, %495, %cst_121 {dimension_numbers = #tpu.dot_dimension_numbers<[1], [0], [0], [1], [0, 0, 1, 1], [], []>} : vector<4x32xf32>, vector<32x3xf32>, vector<4x3xf32> -> vector<4x3xf32>
    %498 = vector.broadcast %496 : vector<1x3xf32> to vector<4x3xf32>
    %499 = arith.addf %497, %498 : vector<4x3xf32>
    %c0_122 = arith.constant 0 : index
    %c0_123 = arith.constant 0 : index
    %c0_124 = arith.constant 0 : index
    %500 = vector.load %arg8[%c0_122, %c0_123, %c0_124] : memref<8x4x3xf32, #tpu.memory_space<vmem>>, vector<1x4x3xf32>
    %501 = vector.shape_cast %500 : vector<1x4x3xf32> to vector<4x3xf32>
    %502 = vector.shape_cast %499 : vector<4x3xf32> to vector<1x4x3xf32>
    tpu.vector_store %arg8[%c0_122, %c0_123, %c0_124], %502 {strides = array<i32>} : memref<8x4x3xf32, #tpu.memory_space<vmem>>, vector<1x4x3xf32>,
    %cst_125 = arith.constant dense<0.000000e+00> : vector<4x3xf32>
    %503 = tpu.matmul %308, %495, %cst_125 {dimension_numbers = #tpu.dot_dimension_numbers<[1], [0], [0], [1], [0, 0, 1, 1], [], []>} : vector<4x32xf32>, vector<32x3xf32>, vector<4x3xf32> -> vector<4x3xf32>
    %504 = vector.broadcast %496 : vector<1x3xf32> to vector<4x3xf32>
    %505 = arith.addf %503, %504 : vector<4x3xf32>
    %c1_126 = arith.constant 1 : index
    %c0_127 = arith.constant 0 : index
    %c0_128 = arith.constant 0 : index
    %506 = vector.load %arg8[%c1_126, %c0_127, %c0_128] : memref<8x4x3xf32, #tpu.memory_space<vmem>>, vector<1x4x3xf32>
    %507 = vector.shape_cast %506 : vector<1x4x3xf32> to vector<4x3xf32>
    %508 = vector.shape_cast %505 : vector<4x3xf32> to vector<1x4x3xf32>
    tpu.vector_store %arg8[%c1_126, %c0_127, %c0_128], %508 {strides = array<i32>} : memref<8x4x3xf32, #tpu.memory_space<vmem>>, vector<1x4x3xf32>,
    %cst_129 = arith.constant dense<0.000000e+00> : vector<4x3xf32>
    %509 = tpu.matmul %338, %495, %cst_129 {dimension_numbers = #tpu.dot_dimension_numbers<[1], [0], [0], [1], [0, 0, 1, 1], [], []>} : vector<4x32xf32>, vector<32x3xf32>, vector<4x3xf32> -> vector<4x3xf32>
    %510 = vector.broadcast %496 : vector<1x3xf32> to vector<4x3xf32>
    %511 = arith.addf %509, %510 : vector<4x3xf32>
    %c2_130 = arith.constant 2 : index
    %c0_131 = arith.constant 0 : index
    %c0_132 = arith.constant 0 : index
    %512 = vector.load %arg8[%c2_130, %c0_131, %c0_132] : memref<8x4x3xf32, #tpu.memory_space<vmem>>, vector<1x4x3xf32>
    %513 = vector.shape_cast %512 : vector<1x4x3xf32> to vector<4x3xf32>
    %514 = vector.shape_cast %511 : vector<4x3xf32> to vector<1x4x3xf32>
    tpu.vector_store %arg8[%c2_130, %c0_131, %c0_132], %514 {strides = array<i32>} : memref<8x4x3xf32, #tpu.memory_space<vmem>>, vector<1x4x3xf32>,
    %cst_133 = arith.constant dense<0.000000e+00> : vector<4x3xf32>
    %515 = tpu.matmul %368, %495, %cst_133 {dimension_numbers = #tpu.dot_dimension_numbers<[1], [0], [0], [1], [0, 0, 1, 1], [], []>} : vector<4x32xf32>, vector<32x3xf32>, vector<4x3xf32> -> vector<4x3xf32>
    %516 = vector.broadcast %496 : vector<1x3xf32> to vector<4x3xf32>
    %517 = arith.addf %515, %516 : vector<4x3xf32>
    %c3_134 = arith.constant 3 : index
    %c0_135 = arith.constant 0 : index
    %c0_136 = arith.constant 0 : index
    %518 = vector.load %arg8[%c3_134, %c0_135, %c0_136] : memref<8x4x3xf32, #tpu.memory_space<vmem>>, vector<1x4x3xf32>
    %519 = vector.shape_cast %518 : vector<1x4x3xf32> to vector<4x3xf32>
    %520 = vector.shape_cast %517 : vector<4x3xf32> to vector<1x4x3xf32>
    tpu.vector_store %arg8[%c3_134, %c0_135, %c0_136], %520 {strides = array<i32>} : memref<8x4x3xf32, #tpu.memory_space<vmem>>, vector<1x4x3xf32>,
    %cst_137 = arith.constant dense<0.000000e+00> : vector<4x3xf32>
    %521 = tpu.matmul %398, %495, %cst_137 {dimension_numbers = #tpu.dot_dimension_numbers<[1], [0], [0], [1], [0, 0, 1, 1], [], []>} : vector<4x32xf32>, vector<32x3xf32>, vector<4x3xf32> -> vector<4x3xf32>
    %522 = vector.broadcast %496 : vector<1x3xf32> to vector<4x3xf32>
    %523 = arith.addf %521, %522 : vector<4x3xf32>
    %c4_138 = arith.constant 4 : index
    %c0_139 = arith.constant 0 : index
    %c0_140 = arith.constant 0 : index
    %524 = vector.load %arg8[%c4_138, %c0_139, %c0_140] : memref<8x4x3xf32, #tpu.memory_space<vmem>>, vector<1x4x3xf32>
    %525 = vector.shape_cast %524 : vector<1x4x3xf32> to vector<4x3xf32>
    %526 = vector.shape_cast %523 : vector<4x3xf32> to vector<1x4x3xf32>
    tpu.vector_store %arg8[%c4_138, %c0_139, %c0_140], %526 {strides = array<i32>} : memref<8x4x3xf32, #tpu.memory_space<vmem>>, vector<1x4x3xf32>,
    %cst_141 = arith.constant dense<0.000000e+00> : vector<4x3xf32>
    %527 = tpu.matmul %428, %495, %cst_141 {dimension_numbers = #tpu.dot_dimension_numbers<[1], [0], [0], [1], [0, 0, 1, 1], [], []>} : vector<4x32xf32>, vector<32x3xf32>, vector<4x3xf32> -> vector<4x3xf32>
    %528 = vector.broadcast %496 : vector<1x3xf32> to vector<4x3xf32>
    %529 = arith.addf %527, %528 : vector<4x3xf32>
    %c5_142 = arith.constant 5 : index
    %c0_143 = arith.constant 0 : index
    %c0_144 = arith.constant 0 : index
    %530 = vector.load %arg8[%c5_142, %c0_143, %c0_144] : memref<8x4x3xf32, #tpu.memory_space<vmem>>, vector<1x4x3xf32>
    %531 = vector.shape_cast %530 : vector<1x4x3xf32> to vector<4x3xf32>
    %532 = vector.shape_cast %529 : vector<4x3xf32> to vector<1x4x3xf32>
    tpu.vector_store %arg8[%c5_142, %c0_143, %c0_144], %532 {strides = array<i32>} : memref<8x4x3xf32, #tpu.memory_space<vmem>>, vector<1x4x3xf32>,
    %cst_145 = arith.constant dense<0.000000e+00> : vector<4x3xf32>
    %533 = tpu.matmul %458, %495, %cst_145 {dimension_numbers = #tpu.dot_dimension_numbers<[1], [0], [0], [1], [0, 0, 1, 1], [], []>} : vector<4x32xf32>, vector<32x3xf32>, vector<4x3xf32> -> vector<4x3xf32>
    %534 = vector.broadcast %496 : vector<1x3xf32> to vector<4x3xf32>
    %535 = arith.addf %533, %534 : vector<4x3xf32>
    %c6_146 = arith.constant 6 : index
    %c0_147 = arith.constant 0 : index
    %c0_148 = arith.constant 0 : index
    %536 = vector.load %arg8[%c6_146, %c0_147, %c0_148] : memref<8x4x3xf32, #tpu.memory_space<vmem>>, vector<1x4x3xf32>
    %537 = vector.shape_cast %536 : vector<1x4x3xf32> to vector<4x3xf32>
    %538 = vector.shape_cast %535 : vector<4x3xf32> to vector<1x4x3xf32>
    tpu.vector_store %arg8[%c6_146, %c0_147, %c0_148], %538 {strides = array<i32>} : memref<8x4x3xf32, #tpu.memory_space<vmem>>, vector<1x4x3xf32>,
    %cst_149 = arith.constant dense<0.000000e+00> : vector<4x3xf32>
    %539 = tpu.matmul %488, %495, %cst_149 {dimension_numbers = #tpu.dot_dimension_numbers<[1], [0], [0], [1], [0, 0, 1, 1], [], []>} : vector<4x32xf32>, vector<32x3xf32>, vector<4x3xf32> -> vector<4x3xf32>
    %540 = vector.broadcast %496 : vector<1x3xf32> to vector<4x3xf32>
    %541 = arith.addf %539, %540 : vector<4x3xf32>
    %c7_150 = arith.constant 7 : index
    %c0_151 = arith.constant 0 : index
    %c0_152 = arith.constant 0 : index
    %542 = vector.load %arg8[%c7_150, %c0_151, %c0_152] : memref<8x4x3xf32, #tpu.memory_space<vmem>>, vector<1x4x3xf32>
    %543 = vector.shape_cast %542 : vector<1x4x3xf32> to vector<4x3xf32>
    %544 = vector.shape_cast %541 : vector<4x3xf32> to vector<1x4x3xf32>
    tpu.vector_store %arg8[%c7_150, %c0_151, %c0_152], %544 {strides = array<i32>} : memref<8x4x3xf32, #tpu.memory_space<vmem>>, vector<1x4x3xf32>,
    return
  }
}

</mosaic_0001>

<bundles_post_ra>
// kernel: net_forward.1
= control target key start
LH: loop header
LB: loop body
LE: loop exit
PB: predicated region body
PF: predicated region fallthrough
CT: control target
= control target key end

     0   :  { %16 = vsyncpa [#allocation3], 0  ;;  %v3631_v1 = vmov 0.0   ;;  %vm3632_vm0 = vmmov 0   ;;  %s4386_s0 = inlined_call_operand.vmem [shape: f32[8,4,128], index: 0, kind: input, shape index: {}]   ;;  %s4387_s1 = inlined_call_operand.vmem [shape: f32[32,128], index: 1, kind: input, shape index: {}]   ;;  %s4388_s2 = inlined_call_operand.vmem [shape: f32[32,128], index: 2, kind: input, shape index: {}]   ;;  %s4389_s3 = inlined_call_operand.vmem [shape: f32[1,128], index: 3, kind: input, shape index: {}]   ;;  %s4390_s4 = inlined_call_operand.vmem [shape: f32[32,3], index: 4, kind: input, shape index: {}]   ;;  %s4391_s5 = inlined_call_operand.vmem [shape: f32[1,3], index: 5, kind: input, shape index: {}]   ;;  %s4392_s6 = inlined_call_operand.vmem [shape: f32[2,4,32], index: 6, kind: input, shape index: {}]   ;;  %s4393_s7 = inlined_call_operand.vmem [shape: f32[2,4,32], index: 7, kind: input, shape index: {}]   ;;  %s4394_s8 = inlined_call_operand.vmem [shape: f32[8,4,3], index: 8, kind: output, shape index: {0}]   ;;  %s4395_s9 = inlined_call_operand.hbm [shape: f32[2,4,32], index: 9, kind: output, shape index: {1}]   ;;  %s4396_s10 = inlined_call_operand.hbm [shape: f32[2,4,32], index: 10, kind: output, shape index: {2}]  }
   0x1   :  { %v3697_v0 = vld [vmem:[%s4388_s2 + $0x18] sm:$0xff]  ;;  %3095 = vmatprep.subr.mxu0 %v3631_v1  ;;  %v3703_v2 = vld [vmem:[%s4388_s2 + $0x10] sm:$0xff]  ;;  %3103 = vmatprep.mubr.msk.f32.mxu0 %vm3632_vm0, %v3631_v1 }
   0x2   :  { %3096 = vmatpush3.msra.mxu0 %v3697_v0  ;;  %3106 = vmatprep.subr.mxu1 %v3631_v1 }
   0x3   :  { %17 = vsyncpa [#allocation5], 0  ;;  %3097 = vmatprep.subr.mxu0 %v3631_v1  ;;  %v3713_v3 = vld [vmem:[%s4388_s2 + $0x8] sm:$0xff]  ;;  %3107 = vmatpush3.msra.mxu1 %v3697_v0  ;;  %v3722_v4 = vld [vmem:[%s4388_s2] sm:$0xff]  ;;  %vm46_vm1 = vcmask 261120   ;;  %s3633_s25 = smov 32  }
   0x4   :  { %3098 = vmatpush3.msra.mxu0 %v3703_v2  ;;  %3108 = vmatprep.subr.mxu1 %v3631_v1  ;;  %v43_v5 = vld [vmem:[%s4392_s6] sm:$0xf]  ;;  %s3634_s26 = smov 64   ;;  %s3635_s29 = smov 96   ;;  %v2871_v25 = vld [vmem:[%s4386_s0 + $0x4] sm:$0xf] }
   0x5   :  { %3099 = vmatprep.subr.mxu0 %v3631_v1  ;;  %3109 = vmatpush3.msra.mxu1 %v3703_v2  ;;  %v45_v6 = vld [vmem:[%s4386_s0] sm:$0xf]  ;;  %v2874_v43 = vld [vmem:[%s4386_s0 + $0x8] sm:$0xf]  ;;  %v2877_v61 = vld [vmem:[%s4386_s0 + $0xc] sm:$0xf] }
   0x6   :  { %3100 = vmatpush3.msra.mxu0 %v3713_v3  ;;  %3110 = vmatprep.subr.mxu1 %v3631_v1  ;;  %v44_v17 = vld [vmem:[%s4393_s7] sm:$0xf]  ;;  %vm863_vm2 = vcmask 257024   ;;  %vm2325_vm3 = vcmask 19456   ;;  %s3636_s23 = smov [#allocation2]   ;;  %s3637_s24 = smov [#allocation4]  }
   0x7   :  { %3101 = vmatprep.subr.mxu0 %v3631_v1  ;;  %3111 = vmatpush3.msra.mxu1 %v3713_v3  ;;  %s2852_s27 = sshll.u32 %s3637_s24, 4  ;;  %s2853_s27 = int_to_ptr.vmem [resolvable:$true] %s2852_s27 }
   0x8   :  { %3102 = vmatpush3.msra.mxu0 %v3722_v4  ;;  %3112 = vmatprep.subr.mxu1 %v3631_v1 }
   0x9   :  { %3104 = vmatmul.mubr.msk.f32.vlgmr.msra.gmra.mxu0 %vm46_vm1, %v43_v5  ;;  %3113 = vmatpush3.msra.mxu1 %v3722_v4 }
   0xa   :  { %3114 = vmatprep.mubr.msk.f32.mxu1 %vm3632_vm0, %v3631_v1  ;;  %3117 = vmatprep.subr.mxu0 %v3631_v1 }
   0xb   :  { %3118 = vmatpush3.msra.mxu0 %v3697_v0  ;;  %3125 = vmatprep.mubr.msk.f32.mxu0 %vm3632_vm0, %v3631_v1 }
   0xc   :  { %3119 = vmatprep.subr.mxu0 %v3631_v1  ;;  %3128 = vmatprep.subr.mxu1 %v3631_v1 }
   0xd   :  { %3120 = vmatpush3.msra.mxu0 %v3703_v2 }
   0xe   :  { %3121 = vmatprep.subr.mxu0 %v3631_v1 }
   0xf   :  { %3122 = vmatpush3.msra.mxu0 %v3713_v3 }
  0x10   :  { %3123 = vmatprep.subr.mxu0 %v3631_v1 }
  0x11   :  { %3124 = vmatpush3.msra.mxu0 %v3722_v4 }
  0x12   :  { %3139 = vmatprep.subr.mxu0 %v3631_v1 }
  0xc9   :  { %v116_v7 = vpop.f32.mrf.mxu0 }
  0xca   :  { %v120_v8 = vadd.f32 %v116_v7, %v45_v6 }
  0xcb   :  { %v3105_v9 = vpop.f32.mrf.mxu0 }
  0xcc   :  { %3455 = vtanh.f32 %v120_v8  ;;  %v2870_v11 = vmul.f32 -1.442695, %v120_v8 }
  0xce   :  { %3457 = vpow2.f32 %v2870_v11 }
  0xd9   :  { %v3456_v10 = vpop.eup %3455 }
  0xda   :  { %130 = vrot.lane.b32.xlu0 %v3456_v10, %s3633_s25 }
  0xdb   :  { %v3458_v12 = vpop.eup %3457 }
  0xdc   :  { %v124_v13 = vadd.f32 1.0, %v3458_v12 }
  0xde   :  { %3459 = vrcp.f32 %v124_v13 }
  0xeb   :  { %v3460_v14 = vpop.eup %3459 }
  0xec   :  { %v127_v18 = vmul.f32 %v3460_v14, %v44_v17 }
 0x14c   :  { %v131_v15 = vpop.permute.xlu0 %130 }
 0x14d   :  { %v133_v16 = vmul.f32 %v3460_v14, %v131_v15 }
 0x14f   :  { %135 = vrot.lane.b32.xlu0 %v133_v16, %s3634_s26 }
 0x1c1   :  { %v136_v19 = vpop.permute.xlu0 %135 }
 0x1c2   :  { %v138_v20 = vadd.f32 %v136_v19, %v127_v18 }
 0x1c4   :  { %3461 = vtanh.f32 %v138_v20 }
 0x1d1   :  { %v3462_v21 = vpop.eup %3461 }
 0x1d2   :  { %141 = vrot.lane.b32.xlu1 %v3462_v21, %s3635_s29 }
 0x244   :  { %v142_v22 = vpop.permute.xlu1 %141 }
 0x245   :  { %v144_v23 = vmul.f32 %v3460_v14, %v142_v22 }
 0x247   :  { %148 = vrot.lane.b32.xlu1 %v144_v23, %s3633_s25 }
 0x2b9   :  { %v3760_v24 = vpop.permute.xlu1 %148 }
 0x2ba   :  { %3115 = vmatmul.mubr.msk.f32.vlgmr.msra.gmra.mxu1 %vm46_vm1, %v3760_v24 }
 0x2bb   :  { %3129 = vmatpush3.msra.mxu1 %v3697_v0  ;;  %3136 = vmatprep.mubr.msk.f32.mxu1 %vm3632_vm0, %v3631_v1 }
 0x2bc   :  { %3130 = vmatprep.subr.mxu1 %v3631_v1 }
 0x2bd   :  { %3131 = vmatpush3.msra.mxu1 %v3703_v2 }
 0x2be   :  { %3132 = vmatprep.subr.mxu1 %v3631_v1 }
 0x2bf   :  { %3133 = vmatpush3.msra.mxu1 %v3713_v3 }
 0x2c0   :  { %3134 = vmatprep.subr.mxu1 %v3631_v1 }
 0x2c1   :  { %3135 = vmatpush3.msra.mxu1 %v3722_v4 }
 0x2c2   :  { %3150 = vmatprep.subr.mxu1 %v3631_v1 }
 0x37a   :  { %v218_v26 = vpop.f32.mrf.mxu1 }
 0x37b   :  { %v222_v27 = vadd.f32 %v2871_v25, %v218_v26 }
 0x37c   :  { %v3116_v28 = vpop.f32.mrf.mxu1 }
 0x37d   :  { %3463 = vtanh.f32 %v222_v27  ;;  %v2873_v30 = vmul.f32 -1.442695, %v222_v27 }
 0x37f   :  { %3465 = vpow2.f32 %v2873_v30 }
 0x38a   :  { %v3464_v29 = vpop.eup %3463 }
 0x38b   :  { %232 = vrot.lane.b32.xlu0 %v3464_v29, %s3633_s25 }
 0x38c   :  { %v3466_v31 = vpop.eup %3465 }
 0x38d   :  { %v226_v32 = vadd.f32 1.0, %v3466_v31 }
 0x38f   :  { %3467 = vrcp.f32 %v226_v32 }
 0x39c   :  { %v3468_v33 = vpop.eup %3467 }
 0x39d   :  { %v229_v36 = vmul.f32 %v3468_v33, %v138_v20  ;;  %v2880_v20 = vld [vmem:[%s4386_s0 + $0x10] sm:$0xf] }
 0x3fd   :  { %v233_v34 = vpop.permute.xlu0 %232 }
 0x3fe   :  { %v235_v35 = vmul.f32 %v3468_v33, %v233_v34 }
 0x400   :  { %237 = vrot.lane.b32.xlu1 %v235_v35, %s3634_s26 }
 0x472   :  { %v238_v37 = vpop.permute.xlu1 %237 }
 0x473   :  { %v240_v38 = vadd.f32 %v238_v37, %v229_v36 }
 0x475   :  { %3469 = vtanh.f32 %v240_v38 }
 0x482   :  { %v3470_v39 = vpop.eup %3469 }
 0x483   :  { %243 = vrot.lane.b32.xlu0 %v3470_v39, %s3635_s29  ;;  %v2883_v39 = vld [vmem:[%s4386_s0 + $0x14] sm:$0xf] }
 0x4f5   :  { %v244_v40 = vpop.permute.xlu0 %243 }
 0x4f6   :  { %v246_v41 = vmul.f32 %v3468_v33, %v244_v40 }
 0x4f8   :  { %250 = vrot.lane.b32.xlu1 %v246_v41, %s3633_s25 }
 0x56a   :  { %v3781_v42 = vpop.permute.xlu1 %250 }
 0x56b   :  { %3126 = vmatmul.mubr.msk.f32.vlgmr.msra.gmra.mxu0 %vm46_vm1, %v3781_v42 }
 0x56c   :  { %3140 = vmatpush3.msra.mxu0 %v3697_v0  ;;  %3147 = vmatprep.mubr.msk.f32.mxu0 %vm3632_vm0, %v3631_v1 }
 0x56d   :  { %3141 = vmatprep.subr.mxu0 %v3631_v1 }
 0x56e   :  { %3142 = vmatpush3.msra.mxu0 %v3703_v2 }
 0x56f   :  { %3143 = vmatprep.subr.mxu0 %v3631_v1 }
 0x570   :  { %3144 = vmatpush3.msra.mxu0 %v3713_v3 }
 0x571   :  { %3145 = vmatprep.subr.mxu0 %v3631_v1 }
 0x572   :  { %3146 = vmatpush3.msra.mxu0 %v3722_v4 }
 0x573   :  { %3161 = vmatprep.subr.mxu0 %v3631_v1 }
 0x62b   :  { %v320_v44 = vpop.f32.mrf.mxu0 }
 0x62c   :  { %v324_v45 = vadd.f32 %v2874_v43, %v320_v44 }
 0x62d   :  { %v3127_v46 = vpop.f32.mrf.mxu0 }
 0x62e   :  { %3471 = vtanh.f32 %v324_v45  ;;  %v2876_v48 = vmul.f32 -1.442695, %v324_v45 }
 0x630   :  { %3473 = vpow2.f32 %v2876_v48 }
 0x63b   :  { %v3472_v47 = vpop.eup %3471 }
 0x63c   :  { %334 = vrot.lane.b32.xlu0 %v3472_v47, %s3633_s25 }
 0x63d   :  { %v3474_v49 = vpop.eup %3473 }
 0x63e   :  { %v328_v50 = vadd.f32 1.0, %v3474_v49 }
 0x640   :  { %3475 = vrcp.f32 %v328_v50 }
 0x64d   :  { %v3476_v51 = vpop.eup %3475 }
 0x64e   :  { %v331_v54 = vmul.f32 %v3476_v51, %v240_v38 }
 0x6ae   :  { %v335_v52 = vpop.permute.xlu0 %334 }
 0x6af   :  { %v337_v53 = vmul.f32 %v3476_v51, %v335_v52 }
 0x6b1   :  { %339 = vrot.lane.b32.xlu1 %v337_v53, %s3634_s26 }
 0x723   :  { %v340_v55 = vpop.permute.xlu1 %339 }
 0x724   :  { %v342_v56 = vadd.f32 %v340_v55, %v331_v54 }
 0x726   :  { %3477 = vtanh.f32 %v342_v56 }
 0x733   :  { %v3478_v57 = vpop.eup %3477 }
 0x734   :  { %345 = vrot.lane.b32.xlu0 %v3478_v57, %s3635_s29  ;;  %v3871_v57 = vld [vmem:[%s4387_s1 + $0x18] sm:$0xff] }
 0x7a6   :  { %v346_v58 = vpop.permute.xlu0 %345 }
 0x7a7   :  { %v348_v59 = vmul.f32 %v3476_v51, %v346_v58 }
 0x7a9   :  { %352 = vrot.lane.b32.xlu1 %v348_v59, %s3633_s25  ;;  %v3880_v59 = vld [vmem:[%s4387_s1 + $0x10] sm:$0xff] }
 0x81b   :  { %v3802_v60 = vpop.permute.xlu1 %352 }
 0x81c   :  { %3137 = vmatmul.mubr.msk.f32.vlgmr.msra.gmra.mxu1 %vm46_vm1, %v3802_v60 }
 0x81d   :  { %3151 = vmatpush3.msra.mxu1 %v3697_v0  ;;  %3158 = vmatprep.mubr.msk.f32.mxu1 %vm3632_vm0, %v3631_v1 }
 0x81e   :  { %3152 = vmatprep.subr.mxu1 %v3631_v1 }
 0x81f   :  { %3153 = vmatpush3.msra.mxu1 %v3703_v2 }
 0x820   :  { %3154 = vmatprep.subr.mxu1 %v3631_v1 }
 0x821   :  { %3155 = vmatpush3.msra.mxu1 %v3713_v3 }
 0x822   :  { %3156 = vmatprep.subr.mxu1 %v3631_v1 }
 0x823   :  { %3157 = vmatpush3.msra.mxu1 %v3722_v4 }
 0x824   :  { %3172 = vmatprep.subr.mxu1 %v3631_v1 }
 0x8dc   :  { %v422_v62 = vpop.f32.mrf.mxu1 }
 0x8dd   :  { %v426_v63 = vadd.f32 %v2877_v61, %v422_v62  ;;  %v3889_v61 = vld [vmem:[%s4387_s1 + $0x8] sm:$0xff]  ;;  %v3896_v62 = vld [vmem:[%s4387_s1] sm:$0xff] }
 0x8de   :  { %v3138_v5 = vpop.f32.mrf.mxu1 }
 0x8df   :  { %3479 = vtanh.f32 %v426_v63  ;;  %v2879_v7 = vmul.f32 -1.442695, %v426_v63 }
 0x8e1   :  { %3481 = vpow2.f32 %v2879_v7 }
 0x8ec   :  { %v3480_v6 = vpop.eup %3479 }
 0x8ed   :  { %436 = vrot.lane.b32.xlu0 %v3480_v6, %s3633_s25 }
 0x8ee   :  { %v3482_v8 = vpop.eup %3481 }
 0x8ef   :  { %v430_v9 = vadd.f32 1.0, %v3482_v8 }
 0x8f1   :  { %3483 = vrcp.f32 %v430_v9 }
 0x8fe   :  { %v3484_v10 = vpop.eup %3483 }
 0x8ff   :  { %v433_v13 = vmul.f32 %v3484_v10, %v342_v56 }
 0x95f   :  { %v437_v11 = vpop.permute.xlu0 %436 }
 0x960   :  { %v439_v12 = vmul.f32 %v3484_v10, %v437_v11 }
 0x962   :  { %441 = vrot.lane.b32.xlu1 %v439_v12, %s3634_s26 }
 0x9d4   :  { %v442_v14 = vpop.permute.xlu1 %441 }
 0x9d5   :  { %v444_v15 = vadd.f32 %v442_v14, %v433_v13 }
 0x9d7   :  { %3485 = vtanh.f32 %v444_v15 }
 0x9e4   :  { %v3486_v16 = vpop.eup %3485 }
 0x9e5   :  { %447 = vrot.lane.b32.xlu0 %v3486_v16, %s3635_s29 }
 0xa57   :  { %v448_v17 = vpop.permute.xlu0 %447 }
 0xa58   :  { %v450_v18 = vmul.f32 %v3484_v10, %v448_v17 }
 0xa5a   :  { %454 = vrot.lane.b32.xlu1 %v450_v18, %s3633_s25 }
 0xacc   :  { %v3823_v19 = vpop.permute.xlu1 %454 }
 0xacd   :  { %3148 = vmatmul.mubr.msk.f32.vlgmr.msra.gmra.mxu0 %vm46_vm1, %v3823_v19 }
 0xace   :  { %3162 = vmatpush3.msra.mxu0 %v3697_v0  ;;  %3169 = vmatprep.mubr.msk.f32.mxu0 %vm3632_vm0, %v3631_v1 }
 0xacf   :  { %3163 = vmatprep.subr.mxu0 %v3631_v1 }
 0xad0   :  { %3164 = vmatpush3.msra.mxu0 %v3703_v2 }
 0xad1   :  { %3165 = vmatprep.subr.mxu0 %v3631_v1 }
 0xad2   :  { %3166 = vmatpush3.msra.mxu0 %v3713_v3 }
 0xad3   :  { %3167 = vmatprep.subr.mxu0 %v3631_v1 }
 0xad4   :  { %3168 = vmatpush3.msra.mxu0 %v3722_v4 }
 0xad5   :  { %3183 = vmatprep.subr.mxu0 %v3631_v1 }
 0xb8d   :  { %v524_v21 = vpop.f32.mrf.mxu0 }
 0xb8e   :  { %v528_v22 = vadd.f32 %v2880_v20, %v524_v21 }
 0xb8f   :  { %v3149_v23 = vpop.f32.mrf.mxu0 }
 0xb90   :  { %3487 = vtanh.f32 %v528_v22  ;;  %v2882_v26 = vmul.f32 -1.442695, %v528_v22 }
 0xb92   :  { %3489 = vpow2.f32 %v2882_v26 }
 0xb9d   :  { %v3488_v25 = vpop.eup %3487 }
 0xb9e   :  { %538 = vrot.lane.b32.xlu0 %v3488_v25, %s3633_s25 }
 0xb9f   :  { %v3490_v27 = vpop.eup %3489 }
 0xba0   :  { %v532_v28 = vadd.f32 1.0, %v3490_v27 }
 0xba2   :  { %3491 = vrcp.f32 %v532_v28 }
 0xbaf   :  { %v3492_v29 = vpop.eup %3491 }
 0xbb0   :  { %v535_v32 = vmul.f32 %v3492_v29, %v444_v15 }
 0xc10   :  { %v539_v30 = vpop.permute.xlu0 %538 }
 0xc11   :  { %v541_v31 = vmul.f32 %v3492_v29, %v539_v30 }
 0xc13   :  { %543 = vrot.lane.b32.xlu1 %v541_v31, %s3634_s26 }
 0xc85   :  { %v544_v33 = vpop.permute.xlu1 %543 }
 0xc86   :  { %v546_v34 = vadd.f32 %v544_v33, %v535_v32  ;;  %v2892_v32 = vld [vmem:[%s4392_s6 + $0x4] sm:$0xf] }
 0xc88   :  { %3493 = vtanh.f32 %v546_v34 }
 0xc95   :  { %v3494_v35 = vpop.eup %3493 }
 0xc96   :  { %549 = vrot.lane.b32.xlu0 %v3494_v35, %s3635_s29 }
 0xd08   :  { %v550_v36 = vpop.permute.xlu0 %549 }
 0xd09   :  { %v552_v37 = vmul.f32 %v3492_v29, %v550_v36 }
 0xd0b   :  { %556 = vrot.lane.b32.xlu1 %v552_v37, %s3633_s25  ;;  %v4040_v37 = vld [vmem:[%s4389_s3] ss:$0 sm:$0xff] }
 0xd7d   :  { %v3844_v38 = vpop.permute.xlu1 %556 }
 0xd7e   :  { %3159 = vmatmul.mubr.msk.f32.vlgmr.msra.gmra.mxu1 %vm46_vm1, %v3844_v38 }
 0xd7f   :  { %3173 = vmatpush3.msra.mxu1 %v3697_v0  ;;  %3180 = vmatprep.mubr.msk.f32.mxu1 %vm3632_vm0, %v3631_v1 }
 0xd80   :  { %3174 = vmatprep.subr.mxu1 %v3631_v1 }
 0xd81   :  { %3175 = vmatpush3.msra.mxu1 %v3703_v2 }
 0xd82   :  { %3176 = vmatprep.subr.mxu1 %v3631_v1 }
 0xd83   :  { %3177 = vmatpush3.msra.mxu1 %v3713_v3 }
 0xd84   :  { %3178 = vmatprep.subr.mxu1 %v3631_v1 }
 0xd85   :  { %3179 = vmatpush3.msra.mxu1 %v3722_v4 }
 0xd86   :  { %3194 = vmatprep.subr.mxu1 %v3631_v1 }
 0xe3e   :  { %v626_v40 = vpop.f32.mrf.mxu1 }
 0xe3f   :  { %v630_v41 = vadd.f32 %v2883_v39, %v626_v40 }
 0xe40   :  { %v3160_v43 = vpop.f32.mrf.mxu1 }
 0xe41   :  { %3495 = vtanh.f32 %v630_v41  ;;  %v2885_v45 = vmul.f32 -1.442695, %v630_v41 }
 0xe43   :  { %3497 = vpow2.f32 %v2885_v45 }
 0xe4e   :  { %v3496_v44 = vpop.eup %3495 }
 0xe4f   :  { %640 = vrot.lane.b32.xlu0 %v3496_v44, %s3633_s25 }
 0xe50   :  { %v3498_v46 = vpop.eup %3497 }
 0xe51   :  { %v634_v47 = vadd.f32 1.0, %v3498_v46 }
 0xe53   :  { %3499 = vrcp.f32 %v634_v47 }
 0xe60   :  { %v3500_v48 = vpop.eup %3499 }
 0xe61   :  { %v637_v51 = vmul.f32 %v3500_v48, %v546_v34 }
 0xec1   :  { %v641_v49 = vpop.permute.xlu0 %640 }
 0xec2   :  { %v643_v50 = vmul.f32 %v3500_v48, %v641_v49 }
 0xec4   :  { %645 = vrot.lane.b32.xlu1 %v643_v50, %s3634_s26  ;;  %v2893_v50 = vld [vmem:[%s4393_s7 + $0x4] sm:$0xf] }
 0xf36   :  { %v646_v52 = vpop.permute.xlu1 %645 }
 0xf37   :  { %v3863_v53 = vadd.f32 %v646_v52, %v637_v51 }
 0xf39   :  { %3501 = vtanh.f32 %v3863_v53 }
 0xf46   :  { %v3502_v54 = vpop.eup %3501 }
 0xf47   :  { %651 = vrot.lane.b32.xlu0 %v3502_v54, %s3635_s29 }
 0xfb9   :  { %v652_v55 = vpop.permute.xlu0 %651 }
 0xfba   :  { %v654_v56 = vmul.f32 %v3500_v48, %v652_v55 }
 0xfbc   :  { %658 = vrot.lane.b32.xlu1 %v654_v56, %s3633_s25 }
0x102e   :  { %v3873_v58 = vpop.permute.xlu1 %658 }
0x102f   :  { %3170 = vmatmul.mubr.msk.f32.vlgmr.msra.gmra.mxu0 %vm46_vm1, %v3873_v58 }
0x1030   :  { %3184 = vmatpush3.msra.mxu0 %v3871_v57  ;;  %3191 = vmatprep.mubr.msk.f32.mxu0 %vm3632_vm0, %v3631_v1 }
0x1031   :  { %3185 = vmatprep.subr.mxu0 %v3631_v1 }
0x1032   :  { %3186 = vmatpush3.msra.mxu0 %v3880_v59 }
0x1033   :  { %3187 = vmatprep.subr.mxu0 %v3631_v1 }
0x1034   :  { %3188 = vmatpush3.msra.mxu0 %v3889_v61 }
0x1035   :  { %3189 = vmatprep.subr.mxu0 %v3631_v1 }
0x1036   :  { %3190 = vmatpush3.msra.mxu0 %v3896_v62 }
0x1037   :  { %3192 = vmatmul.mubr.msk.f32.vlgmr.msra.gmra.mxu0 %vm46_vm1, %v3760_v24  ;;  %3205 = vmatprep.subr.mxu0 %v3631_v1  ;;  %v2886_v24 = vld [vmem:[%s4386_s0 + $0x18] sm:$0xf] }
0x1038   :  { %3206 = vmatpush3.msra.mxu0 %v3871_v57  ;;  %3213 = vmatprep.mubr.msk.f32.mxu0 %vm3632_vm0, %v3631_v1 }
0x1039   :  { %3207 = vmatprep.subr.mxu0 %v3631_v1 }
0x103a   :  { %3208 = vmatpush3.msra.mxu0 %v3880_v59 }
0x103b   :  { %3209 = vmatprep.subr.mxu0 %v3631_v1 }
0x103c   :  { %3210 = vmatpush3.msra.mxu0 %v3889_v61 }
0x103d   :  { %3211 = vmatprep.subr.mxu0 %v3631_v1 }
0x103e   :  { %3212 = vmatpush3.msra.mxu0 %v3896_v62 }
0x103f   :  { %3214 = vmatmul.mubr.msk.f32.vlgmr.msra.gmra.mxu0 %vm46_vm1, %v3781_v42  ;;  %3227 = vmatprep.subr.mxu0 %v3631_v1 }
0x1040   :  { %3228 = vmatpush3.msra.mxu0 %v3871_v57  ;;  %3235 = vmatprep.mubr.msk.f32.mxu0 %vm3632_vm0, %v3631_v1 }
0x1041   :  { %3229 = vmatprep.subr.mxu0 %v3631_v1 }
0x1042   :  { %3230 = vmatpush3.msra.mxu0 %v3880_v59 }
0x1043   :  { %3231 = vmatprep.subr.mxu0 %v3631_v1 }
0x1044   :  { %3232 = vmatpush3.msra.mxu0 %v3889_v61 }
0x1045   :  { %3233 = vmatprep.subr.mxu0 %v3631_v1 }
0x1046   :  { %3234 = vmatpush3.msra.mxu0 %v3896_v62 }
0x1047   :  { %3236 = vmatmul.mubr.msk.f32.vlgmr.msra.gmra.mxu0 %vm46_vm1, %v3802_v60  ;;  %3249 = vmatprep.subr.mxu0 %v3631_v1 }
0x1048   :  { %3250 = vmatpush3.msra.mxu0 %v3871_v57  ;;  %3257 = vmatprep.mubr.msk.f32.mxu0 %vm3632_vm0, %v3631_v1 }
0x1049   :  { %3251 = vmatprep.subr.mxu0 %v3631_v1 }
0x104a   :  { %3252 = vmatpush3.msra.mxu0 %v3880_v59 }
0x104b   :  { %3253 = vmatprep.subr.mxu0 %v3631_v1 }
0x104c   :  { %3254 = vmatpush3.msra.mxu0 %v3889_v61 }
0x104d   :  { %3255 = vmatprep.subr.mxu0 %v3631_v1 }
0x104e   :  { %3256 = vmatpush3.msra.mxu0 %v3896_v62 }
0x104f   :  { %3258 = vmatmul.mubr.msk.f32.vlgmr.msra.gmra.mxu0 %vm46_vm1, %v3823_v19  ;;  %3271 = vmatprep.subr.mxu0 %v3631_v1 }
0x1050   :  { %3272 = vmatpush3.msra.mxu0 %v3871_v57  ;;  %3279 = vmatprep.mubr.msk.f32.mxu0 %vm3632_vm0, %v3631_v1 }
0x1051   :  { %3273 = vmatprep.subr.mxu0 %v3631_v1 }
0x1052   :  { %3274 = vmatpush3.msra.mxu0 %v3880_v59 }
0x1053   :  { %3275 = vmatprep.subr.mxu0 %v3631_v1 }
0x1054   :  { %3276 = vmatpush3.msra.mxu0 %v3889_v61 }
0x1055   :  { %3277 = vmatprep.subr.mxu0 %v3631_v1 }
0x1056   :  { %3278 = vmatpush3.msra.mxu0 %v3896_v62 }
0x1057   :  { %3280 = vmatmul.mubr.msk.f32.vlgmr.msra.gmra.mxu0 %vm46_vm1, %v3844_v38  ;;  %3293 = vmatprep.subr.mxu0 %v3631_v1 }
0x1058   :  { %3294 = vmatpush3.msra.mxu0 %v3871_v57  ;;  %3301 = vmatprep.mubr.msk.f32.mxu0 %vm3632_vm0, %v3631_v1 }
0x1059   :  { %3295 = vmatprep.subr.mxu0 %v3631_v1 }
0x105a   :  { %3296 = vmatpush3.msra.mxu0 %v3880_v59 }
0x105b   :  { %3297 = vmatprep.subr.mxu0 %v3631_v1 }
0x105c   :  { %3298 = vmatpush3.msra.mxu0 %v3889_v61 }
0x105d   :  { %3299 = vmatprep.subr.mxu0 %v3631_v1 }
0x105e   :  { %3300 = vmatpush3.msra.mxu0 %v3896_v62 }
0x105f   :  { %3302 = vmatmul.mubr.msk.f32.vlgmr.msra.gmra.mxu0 %vm46_vm1, %v3873_v58  ;;  %3315 = vmatprep.subr.mxu0 %v3631_v1 }
0x1060   :  { %3316 = vmatpush3.msra.mxu0 %v3871_v57  ;;  %3323 = vmatprep.mubr.msk.f32.mxu0 %vm3632_vm0, %v3631_v1 }
0x1061   :  { %3317 = vmatprep.subr.mxu0 %v3631_v1 }
0x1062   :  { %3318 = vmatpush3.msra.mxu0 %v3880_v59 }
0x1063   :  { %3319 = vmatprep.subr.mxu0 %v3631_v1 }
0x1064   :  { %3320 = vmatpush3.msra.mxu0 %v3889_v61 }
0x1065   :  { %3321 = vmatprep.subr.mxu0 %v3631_v1 }
0x1066   :  { %3322 = vmatpush3.msra.mxu0 %v3896_v62 }
0x1067   :  { %3337 = vmatprep.subr.mxu0 %v3631_v1 }
0x10ef   :  { %v728_v42 = vpop.f32.mrf.mxu0 }
0x10f0   :  { %v732_v60 = vadd.f32 %v2886_v24, %v728_v42 }
0x10f1   :  { %v3171_v63 = vpop.f32.mrf.mxu0 }
0x10f2   :  { %3503 = vtanh.f32 %v732_v60  ;;  %v2888_v18 = vmul.f32 -1.442695, %v732_v60 }
0x10f4   :  { %3505 = vpow2.f32 %v2888_v18 }
0x10f7   :  { %v3977_v5 = vpop.f32.mrf.mxu0 }
0x10f8   :  { %v943_v38 = vadd.f32 %v4040_v37, %v3977_v5 }
0x10f9   :  { %v3193_v6 = vpop.f32.mrf.mxu0 }
0x10ff   :  { %v3504_v7 = vpop.eup %3503  ;;  %v3979_v8 = vpop.f32.mrf.mxu0 }
0x1100   :  { %742 = vrot.lane.b32.xlu0 %v3504_v7, %s3633_s25  ;;  %v1111_v58 = vadd.f32 %v4040_v37, %v3979_v8 }
0x1101   :  { %v3215_v9 = vpop.f32.mrf.mxu0  ;;  %v3506_v19 = vpop.eup %3505 }
0x1102   :  { %v736_v20 = vadd.f32 1.0, %v3506_v19 }
0x1104   :  { %3507 = vrcp.f32 %v736_v20 }
0x1107   :  { %v3982_v10 = vpop.f32.mrf.mxu0 }
0x1108   :  { %v1281_v19 = vadd.f32 %v4040_v37, %v3982_v10 }
0x1109   :  { %v3237_v11 = vpop.f32.mrf.mxu0 }
0x110f   :  { %v3984_v12 = vpop.f32.mrf.mxu0 }
0x1111   :  { %v3259_v13 = vpop.f32.mrf.mxu0  ;;  %v3508_v21 = vpop.eup %3507 }
0x1112   :  { %v739_v25 = vmul.f32 %v3508_v21, %v3863_v53 }
0x1117   :  { %v3986_v14 = vpop.f32.mrf.mxu0 }
0x1119   :  { %v3281_v15 = vpop.f32.mrf.mxu0 }
0x111f   :  { %v3988_v16 = vpop.f32.mrf.mxu0 }
0x1121   :  { %v3303_v17 = vpop.f32.mrf.mxu0 }
0x1172   :  { %v743_v22 = vpop.permute.xlu0 %742 }
0x1173   :  { %v745_v23 = vmul.f32 %v3508_v21, %v743_v22 }
0x1175   :  { %747 = vrot.lane.b32.xlu1 %v745_v23, %s3634_s26 }
0x11e7   :  { %v748_v26 = vpop.permute.xlu1 %747 }
0x11e8   :  { %v3992_v27 = vadd.f32 %v748_v26, %v739_v25 }
0x11ea   :  { %3509 = vtanh.f32 %v3992_v27 }
0x11f7   :  { %v3510_v28 = vpop.eup %3509 }
0x11f8   :  { %753 = vrot.lane.b32.xlu0 %v3510_v28, %s3635_s29 }
0x126a   :  { %v754_v29 = vpop.permute.xlu0 %753 }
0x126b   :  { %v756_v30 = vmul.f32 %v3508_v21, %v754_v29 }
0x126d   :  { %760 = vrot.lane.b32.xlu1 %v756_v30, %s3633_s25 }
0x12df   :  { %v761_v31 = vpop.permute.xlu1 %760 }
0x12e0   :  { %3181 = vmatmul.mubr.msk.f32.vlgmr.msra.gmra.mxu1 %vm46_vm1, %v761_v31  ;;  %3324 = vmatmul.mubr.msk.f32.vlgmr.msra.gmra.mxu0 %vm46_vm1, %v761_v31 }
0x12e1   :  { %3195 = vmatpush3.msra.mxu1 %v3697_v0  ;;  %3202 = vmatprep.mubr.msk.f32.mxu1 %vm3632_vm0, %v3631_v1 }
0x12e2   :  { %3196 = vmatprep.subr.mxu1 %v3631_v1  ;;  %3338 = vmatpush3.msra.mxu0 %v3871_v57 }
0x12e3   :  { %3197 = vmatpush3.msra.mxu1 %v3703_v2  ;;  %3339 = vmatprep.subr.mxu0 %v3631_v1 }
0x12e4   :  { %3198 = vmatprep.subr.mxu1 %v3631_v1  ;;  %3340 = vmatpush3.msra.mxu0 %v3880_v59 }
0x12e5   :  { %3199 = vmatpush3.msra.mxu1 %v3713_v3  ;;  %3341 = vmatprep.subr.mxu0 %v3631_v1 }
0x12e6   :  { %3200 = vmatprep.subr.mxu1 %v3631_v1  ;;  %3342 = vmatpush3.msra.mxu0 %v3889_v61 }
0x12e7   :  { %3201 = vmatpush3.msra.mxu1 %v3722_v4  ;;  %3343 = vmatprep.subr.mxu0 %v3631_v1 }
0x12e8   :  { %3203 = vmatmul.mubr.msk.f32.vlgmr.msra.gmra.mxu1 %vm46_vm1, %v2892_v32  ;;  %3216 = vmatprep.subr.mxu1 %v3631_v1 }
0x12e9   :  { %3217 = vmatpush3.msra.mxu1 %v3697_v0  ;;  %3224 = vmatprep.mubr.msk.f32.mxu1 %vm3632_vm0, %v3631_v1 }
0x12ea   :  { %3218 = vmatprep.subr.mxu1 %v3631_v1  ;;  %3344 = vmatpush3.msra.mxu0 %v3896_v62 }
0x12eb   :  { %3219 = vmatpush3.msra.mxu1 %v3703_v2  ;;  %3345 = vmatprep.mubr.msk.f32.mxu0 %vm3632_vm0, %v3631_v1 }
0x12ec   :  { %3220 = vmatprep.subr.mxu1 %v3631_v1  ;;  %3359 = vmatprep.subr.mxu0 %v3631_v1 }
0x12ed   :  { %3221 = vmatpush3.msra.mxu1 %v3713_v3 }
0x12ee   :  { %3222 = vmatprep.subr.mxu1 %v3631_v1 }
0x12ef   :  { %3223 = vmatpush3.msra.mxu1 %v3722_v4 }
0x12f0   :  { %3238 = vmatprep.subr.mxu1 %v3631_v1 }
0x13a0   :  { %v4033_v33 = vpop.f32.mrf.mxu1  ;;  %v4035_v34 = vpop.f32.mrf.mxu0 }
0x13a2   :  { %v3182_v35 = vpop.f32.mrf.mxu1  ;;  %v3325_v36 = vpop.f32.mrf.mxu0 }
0x13a8   :  { %v1015_v39 = vpop.f32.mrf.mxu1 }
0x13a9   :  { %v1019_v40 = vadd.f32 %v1015_v39, %v943_v38 }
0x13aa   :  { %v3204_v41 = vpop.f32.mrf.mxu1 }
0x13ab   :  { %3511 = vtanh.f32 %v1019_v40  ;;  %v2897_v44 = vmul.f32 -1.442695, %v1019_v40 }
0x13ad   :  { %3513 = vpow2.f32 %v2897_v44 }
0x13b8   :  { %v3512_v43 = vpop.eup %3511 }
0x13b9   :  { %1029 = vrot.lane.b32.xlu0 %v3512_v43, %s3633_s25 }
0x13ba   :  { %v3514_v45 = vpop.eup %3513 }
0x13bb   :  { %v1023_v46 = vadd.f32 1.0, %v3514_v45 }
0x13bd   :  { %3515 = vrcp.f32 %v1023_v46 }
0x13ca   :  { %v3516_v47 = vpop.eup %3515 }
0x13cb   :  { %v1026_v51 = vmul.f32 %v3516_v47, %v2893_v50 }
0x142b   :  { %v1030_v48 = vpop.permute.xlu0 %1029 }
0x142c   :  { %v1032_v49 = vmul.f32 %v3516_v47, %v1030_v48 }
0x142e   :  { %1034 = vrot.lane.b32.xlu1 %v1032_v49, %s3634_s26 }
0x14a0   :  { %v1035_v52 = vpop.permute.xlu1 %1034 }
0x14a1   :  { %v1037_v53 = vadd.f32 %v1035_v52, %v1026_v51 }
0x14a3   :  { %3517 = vtanh.f32 %v1037_v53 }
0x14b0   :  { %v3518_v54 = vpop.eup %3517 }
0x14b1   :  { %1040 = vrot.lane.b32.xlu0 %v3518_v54, %s3635_s29 }
0x1523   :  { %v1041_v55 = vpop.permute.xlu0 %1040 }
0x1524   :  { %v1043_v56 = vmul.f32 %v3516_v47, %v1041_v55  ;;  %v4118_v55 = vld [vmem:[%s4388_s2 + $0x18] sm:$0xff] }
0x1526   :  { %1115 = vrot.lane.b32.xlu1 %v1043_v56, %s3633_s25  ;;  %v4127_v56 = vld [vmem:[%s4388_s2 + $0x10] sm:$0xff] }
0x1598   :  { %v4051_v57 = vpop.permute.xlu1 %1115 }
0x1599   :  { %3225 = vmatmul.mubr.msk.f32.vlgmr.msra.gmra.mxu1 %vm46_vm1, %v4051_v57 }
0x159a   :  { %3239 = vmatpush3.msra.mxu1 %v3697_v0  ;;  %3246 = vmatprep.mubr.msk.f32.mxu1 %vm3632_vm0, %v3631_v1 }
0x159b   :  { %3240 = vmatprep.subr.mxu1 %v3631_v1 }
0x159c   :  { %3241 = vmatpush3.msra.mxu1 %v3703_v2 }
0x159d   :  { %3242 = vmatprep.subr.mxu1 %v3631_v1 }
0x159e   :  { %3243 = vmatpush3.msra.mxu1 %v3713_v3 }
0x159f   :  { %3244 = vmatprep.subr.mxu1 %v3631_v1 }
0x15a0   :  { %3245 = vmatpush3.msra.mxu1 %v3722_v4 }
0x15a1   :  { %3260 = vmatprep.subr.mxu1 %v3631_v1 }
0x1659   :  { %v1185_v59 = vpop.f32.mrf.mxu1 }
0x165a   :  { %v1189_v61 = vadd.f32 %v1185_v59, %v1111_v58  ;;  %v4134_v58 = vld [vmem:[%s4388_s2 + $0x8] sm:$0xff]  ;;  %v4141_v59 = vld [vmem:[%s4388_s2] sm:$0xff] }
0x165b   :  { %v3226_v62 = vpop.f32.mrf.mxu1 }
0x165c   :  { %3519 = vtanh.f32 %v1189_v61  ;;  %v2900_v42 = vmul.f32 -1.442695, %v1189_v61  ;;  %v1621_v61 = vadd.f32 %v4040_v37, %v3986_v14 }
0x165e   :  { %3521 = vpow2.f32 %v2900_v42 }
0x1669   :  { %v3520_v24 = vpop.eup %3519 }
0x166a   :  { %1199 = vrot.lane.b32.xlu0 %v3520_v24, %s3633_s25 }
0x166b   :  { %v3522_v60 = vpop.eup %3521 }
0x166c   :  { %v1193_v63 = vadd.f32 1.0, %v3522_v60 }
0x166e   :  { %3523 = vrcp.f32 %v1193_v63 }
0x167b   :  { %v3524_v5 = vpop.eup %3523 }
0x167c   :  { %v1196_v9 = vmul.f32 %v3524_v5, %v1037_v53 }
0x16dc   :  { %v1200_v6 = vpop.permute.xlu0 %1199 }
0x16dd   :  { %v1202_v7 = vmul.f32 %v3524_v5, %v1200_v6 }
0x16df   :  { %1204 = vrot.lane.b32.xlu1 %v1202_v7, %s3634_s26 }
0x1751   :  { %v1205_v11 = vpop.permute.xlu1 %1204 }
0x1752   :  { %v1207_v8 = vadd.f32 %v1205_v11, %v1196_v9 }
0x1754   :  { %3525 = vtanh.f32 %v1207_v8 }
0x1761   :  { %v3526_v13 = vpop.eup %3525 }
0x1762   :  { %1210 = vrot.lane.b32.xlu0 %v3526_v13, %s3635_s29 }
0x17d4   :  { %v1211_v15 = vpop.permute.xlu0 %1210 }
0x17d5   :  { %v1213_v17 = vmul.f32 %v3524_v5, %v1211_v15 }
0x17d7   :  { %1285 = vrot.lane.b32.xlu1 %v1213_v17, %s3633_s25 }
0x1849   :  { %v4071_v18 = vpop.permute.xlu1 %1285 }
0x184a   :  { %3247 = vmatmul.mubr.msk.f32.vlgmr.msra.gmra.mxu1 %vm46_vm1, %v4071_v18 }
0x184b   :  { %3261 = vmatpush3.msra.mxu1 %v3697_v0  ;;  %3268 = vmatprep.mubr.msk.f32.mxu1 %vm3632_vm0, %v3631_v1 }
0x184c   :  { %3262 = vmatprep.subr.mxu1 %v3631_v1 }
0x184d   :  { %3263 = vmatpush3.msra.mxu1 %v3703_v2 }
0x184e   :  { %3264 = vmatprep.subr.mxu1 %v3631_v1 }
0x184f   :  { %3265 = vmatpush3.msra.mxu1 %v3713_v3 }
0x1850   :  { %3266 = vmatprep.subr.mxu1 %v3631_v1 }
0x1851   :  { %3267 = vmatpush3.msra.mxu1 %v3722_v4 }
0x1852   :  { %3282 = vmatprep.subr.mxu1 %v3631_v1 }
0x190a   :  { %v1355_v20 = vpop.f32.mrf.mxu1 }
0x190b   :  { %v1359_v21 = vadd.f32 %v1355_v20, %v1281_v19 }
0x190c   :  { %v3248_v22 = vpop.f32.mrf.mxu1 }
0x190d   :  { %3527 = vtanh.f32 %v1359_v21  ;;  %v2903_v25 = vmul.f32 -1.442695, %v1359_v21  ;;  %v1791_v21 = vadd.f32 %v4040_v37, %v3988_v16  ;;  %v2889_v16 = vld [vmem:[%s4386_s0 + $0x1c] sm:$0xf]  ;;  %s2840_s0 = sshll.u32 %s3636_s23, 4  ;;  %s2841_s0 = int_to_ptr.vmem [resolvable:$true] %s2840_s0 }
0x190e   :  { %s3587_s28 = scalar_lea.vmem %s2841_s0, 128  ;;  %p3592_p1 = scmp.lt.s32.totalorder %s2841_s0, %s2841_s0 }
0x190f   :  { %3529 = vpow2.f32 %v2903_v25  ;;  %p3588_p0 = scmp.ne.s32.totalorder %s2841_s0, %s3587_s28  ;;  %p3593_p2 = scmp.lt.s32.totalorder %s3587_s28, %s3587_s28 }
0x1911   :  { %p3594_p3 = por %p3593_p2, %p3592_p1 }
0x1913   :  { %p3595_p4 = pnand %p3594_p3, %p3588_p0 }
0x191a   :  { %v3528_v23 = vpop.eup %3527 }
0x191b   :  { %1369 = vrot.lane.b32.xlu0 %v3528_v23, %s3633_s25 }
0x191c   :  { %v3530_v26 = vpop.eup %3529 }
0x191d   :  { %v1363_v28 = vadd.f32 1.0, %v3530_v26 }
0x191f   :  { %3531 = vrcp.f32 %v1363_v28 }
0x192c   :  { %v3532_v29 = vpop.eup %3531 }
0x192d   :  { %v1366_v32 = vmul.f32 %v3532_v29, %v1207_v8 }
0x198d   :  { %v1370_v30 = vpop.permute.xlu0 %1369 }
0x198e   :  { %v1372_v31 = vmul.f32 %v3532_v29, %v1370_v30 }
0x1990   :  { %1374 = vrot.lane.b32.xlu1 %v1372_v31, %s3634_s26 }
0x1a02   :  { %v1375_v35 = vpop.permute.xlu1 %1374 }
0x1a03   :  { %v1377_v10 = vadd.f32 %v1375_v35, %v1366_v32 }
0x1a05   :  { %3533 = vtanh.f32 %v1377_v10 }
0x1a12   :  { %v3534_v36 = vpop.eup %3533 }
0x1a13   :  { %1380 = vrot.lane.b32.xlu0 %v3534_v36, %s3635_s29 }
0x1a85   :  { %v1381_v38 = vpop.permute.xlu0 %1380 }
0x1a86   :  { %v1383_v39 = vmul.f32 %v3532_v29, %v1381_v38 }
0x1a88   :  { %1455 = vrot.lane.b32.xlu1 %v1383_v39, %s3633_s25  ;;  %v834_v39 = vadd.f32 %v2889_v16, %v4033_v33 }
0x1afa   :  { %v4091_v40 = vpop.permute.xlu1 %1455 }
0x1afb   :  { %3269 = vmatmul.mubr.msk.f32.vlgmr.msra.gmra.mxu1 %vm46_vm1, %v4091_v40 }
0x1afc   :  { %3283 = vmatpush3.msra.mxu1 %v3697_v0  ;;  %3290 = vmatprep.mubr.msk.f32.mxu1 %vm3632_vm0, %v3631_v1  ;;  %v1451_v0 = vadd.f32 %v4040_v37, %v3984_v12 }
0x1afd   :  { %3284 = vmatprep.subr.mxu1 %v3631_v1 }
0x1afe   :  { %3285 = vmatpush3.msra.mxu1 %v3703_v2 }
0x1aff   :  { %3286 = vmatprep.subr.mxu1 %v3631_v1 }
0x1b00   :  { %3287 = vmatpush3.msra.mxu1 %v3713_v3 }
0x1b01   :  { %3288 = vmatprep.subr.mxu1 %v3631_v1 }
0x1b02   :  { %3289 = vmatpush3.msra.mxu1 %v3722_v4 }
0x1b03   :  { %3304 = vmatprep.subr.mxu1 %v3631_v1 }
0x1bbb   :  { %v1525_v41 = vpop.f32.mrf.mxu1 }
0x1bbc   :  { %v1529_v43 = vadd.f32 %v1525_v41, %v1451_v0 }
0x1bbd   :  { %v3270_v44 = vpop.f32.mrf.mxu1 }
0x1bbe   :  { %3535 = vtanh.f32 %v1529_v43  ;;  %v2906_v2 = vmul.f32 -1.442695, %v1529_v43  ;;  %v2891_v43 = vmul.f32 -1.442695, %v834_v39 }
0x1bc0   :  { %3537 = vpow2.f32 %v2906_v2 }
0x1bcb   :  { %v3536_v45 = vpop.eup %3535 }
0x1bcc   :  { %1539 = vrot.lane.b32.xlu0 %v3536_v45, %s3633_s25 }
0x1bcd   :  { %v3538_v46 = vpop.eup %3537 }
0x1bce   :  { %v1533_v3 = vadd.f32 1.0, %v3538_v46 }
0x1bd0   :  { %3539 = vrcp.f32 %v1533_v3 }
0x1bdd   :  { %v3540_v47 = vpop.eup %3539 }
0x1bde   :  { %v1536_v49 = vmul.f32 %v3540_v47, %v1377_v10 }
0x1c3e   :  { %v1540_v48 = vpop.permute.xlu0 %1539 }
0x1c3f   :  { %v1542_v4 = vmul.f32 %v3540_v47, %v1540_v48 }
0x1c41   :  { %1544 = vrot.lane.b32.xlu1 %v1542_v4, %s3634_s26 }
0x1cb3   :  { %v1545_v50 = vpop.permute.xlu1 %1544 }
0x1cb4   :  { %v1547_v12 = vadd.f32 %v1545_v50, %v1536_v49 }
0x1cb6   :  { %3541 = vtanh.f32 %v1547_v12 }
0x1cc3   :  { %v3542_v51 = vpop.eup %3541 }
0x1cc4   :  { %1550 = vrot.lane.b32.xlu0 %v3542_v51, %s3635_s29 }
0x1d36   :  { %v1551_v52 = vpop.permute.xlu0 %1550 }
0x1d37   :  { %v1553_v53 = vmul.f32 %v3540_v47, %v1551_v52  ;;  %v1961_v52 = vadd.f32 %v4040_v37, %v4035_v34  ;;  %v4211_v34 = vld [vmem:[%s4390_s4 + $0x10] sm:$0xff] }
0x1d39   :  { %1625 = vrot.lane.b32.xlu1 %v1553_v53, %s3633_s25 }
0x1dab   :  { %v4111_v54 = vpop.permute.xlu1 %1625 }
0x1dac   :  { %3291 = vmatmul.mubr.msk.f32.vlgmr.msra.gmra.mxu1 %vm46_vm1, %v4111_v54 }
0x1dad   :  { %3305 = vmatpush3.msra.mxu1 %v4118_v55  ;;  %3312 = vmatprep.mubr.msk.f32.mxu1 %vm3632_vm0, %v3631_v1 }
0x1dae   :  { %3306 = vmatprep.subr.mxu1 %v3631_v1 }
0x1daf   :  { %3307 = vmatpush3.msra.mxu1 %v4127_v56 }
0x1db0   :  { %3308 = vmatprep.subr.mxu1 %v3631_v1 }
0x1db1   :  { %3309 = vmatpush3.msra.mxu1 %v4134_v58 }
0x1db2   :  { %3310 = vmatprep.subr.mxu1 %v3631_v1 }
0x1db3   :  { %3311 = vmatpush3.msra.mxu1 %v4141_v59 }
0x1db4   :  { %3326 = vmatprep.subr.mxu1 %v3631_v1 }
0x1e6c   :  { %v1695_v62 = vpop.f32.mrf.mxu1 }
0x1e6d   :  { %v1699_v24 = vadd.f32 %v1695_v62, %v1621_v61  ;;  %v4220_v62 = vld [vmem:[%s4390_s4 + $0x8] sm:$0xff] }
0x1e6e   :  { %v3292_v42 = vpop.f32.mrf.mxu1 }
0x1e6f   :  { %3543 = vtanh.f32 %v1699_v24  ;;  %v2909_v63 = vmul.f32 -1.442695, %v1699_v24  ;;  %v4227_v24 = vld [vmem:[%s4390_s4] sm:$0xff] }
0x1e71   :  { %3545 = vpow2.f32 %v2909_v63 }
0x1e7c   :  { %v3544_v60 = vpop.eup %3543 }
0x1e7d   :  { %1709 = vrot.lane.b32.xlu0 %v3544_v60, %s3633_s25 }
0x1e7e   :  { %v3546_v5 = vpop.eup %3545 }
0x1e7f   :  { %v1703_v6 = vadd.f32 1.0, %v3546_v5 }
0x1e81   :  { %3547 = vrcp.f32 %v1703_v6 }
0x1e8e   :  { %v3548_v7 = vpop.eup %3547 }
0x1e8f   :  { %v1706_v8 = vmul.f32 %v3548_v7, %v1547_v12 }
0x1eef   :  { %v1710_v9 = vpop.permute.xlu0 %1709 }
0x1ef0   :  { %v1712_v11 = vmul.f32 %v3548_v7, %v1710_v9 }
0x1ef2   :  { %1714 = vrot.lane.b32.xlu1 %v1712_v11, %s3634_s26 }
0x1f64   :  { %v1715_v13 = vpop.permute.xlu1 %1714 }
0x1f65   :  { %v1717_v14 = vadd.f32 %v1715_v13, %v1706_v8  ;;  %v4276_v13 = vld [vmem:[%s4391_s5] ss:$0 sm:$0xff] }
0x1f67   :  { %3549 = vtanh.f32 %v1717_v14 }
0x1f74   :  { %v3550_v15 = vpop.eup %3549 }
0x1f75   :  { %1720 = vrot.lane.b32.xlu0 %v3550_v15, %s3635_s29 }
0x1fe7   :  { %v1721_v17 = vpop.permute.xlu0 %1720 }
0x1fe8   :  { %v1723_v19 = vmul.f32 %v3548_v7, %v1721_v17 }
0x1fea   :  { %1795 = vrot.lane.b32.xlu1 %v1723_v19, %s3633_s25 }
0x205c   :  { %v4151_v20 = vpop.permute.xlu1 %1795 }
0x205d   :  { %3313 = vmatmul.mubr.msk.f32.vlgmr.msra.gmra.mxu1 %vm46_vm1, %v4151_v20 }
0x205e   :  { %3327 = vmatpush3.msra.mxu1 %v4118_v55  ;;  %3334 = vmatprep.mubr.msk.f32.mxu1 %vm3632_vm0, %v3631_v1 }
0x205f   :  { %3328 = vmatprep.subr.mxu1 %v3631_v1 }
0x2060   :  { %3329 = vmatpush3.msra.mxu1 %v4127_v56 }
0x2061   :  { %3330 = vmatprep.subr.mxu1 %v3631_v1 }
0x2062   :  { %3331 = vmatpush3.msra.mxu1 %v4134_v58 }
0x2063   :  { %3332 = vmatprep.subr.mxu1 %v3631_v1 }
0x2064   :  { %3333 = vmatpush3.msra.mxu1 %v4141_v59 }
0x2065   :  { %3348 = vmatprep.subr.mxu1 %v3631_v1 }
0x211d   :  { %v1865_v22 = vpop.f32.mrf.mxu1 }
0x211e   :  { %v1869_v23 = vadd.f32 %v1865_v22, %v1791_v21 }
0x211f   :  { %v3314_v25 = vpop.f32.mrf.mxu1 }
0x2120   :  { %3551 = vtanh.f32 %v1869_v23  ;;  %v2912_v28 = vmul.f32 -1.442695, %v1869_v23 }
0x2122   :  { %3553 = vpow2.f32 %v2912_v28 }
0x212d   :  { %v3552_v26 = vpop.eup %3551 }
0x212e   :  { %1879 = vrot.lane.b32.xlu0 %v3552_v26, %s3633_s25 }
0x212f   :  { %v3554_v29 = vpop.eup %3553 }
0x2130   :  { %v1873_v30 = vadd.f32 1.0, %v3554_v29 }
0x2132   :  { %3555 = vrcp.f32 %v1873_v30 }
0x213f   :  { %v3556_v31 = vpop.eup %3555 }
0x2140   :  { %v1876_v10 = vmul.f32 %v3556_v31, %v1717_v14 }
0x21a0   :  { %v1880_v32 = vpop.permute.xlu0 %1879 }
0x21a1   :  { %v1882_v35 = vmul.f32 %v3556_v31, %v1880_v32 }
0x21a3   :  { %1884 = vrot.lane.b32.xlu1 %v1882_v35, %s3634_s26 }
0x2215   :  { %v1885_v36 = vpop.permute.xlu1 %1884 }
0x2216   :  { %v4172_v38 = vadd.f32 %v1885_v36, %v1876_v10 }
0x2218   :  { %3557 = vtanh.f32 %v4172_v38 }
0x2219   :  { %3559 = vtanh.f32 %v834_v39 }
0x221a   :  { %3561 = vpow2.f32 %v2891_v43 }
0x2225   :  { %v3558_v0 = vpop.eup %3557 }
0x2226   :  { %1890 = vrot.lane.b32.xlu0 %v3558_v0, %s3635_s29  ;;  %v3560_v41 = vpop.eup %3559 }
0x2227   :  { %v3562_v44 = vpop.eup %3561 }
0x2228   :  { %v838_v45 = vadd.f32 1.0, %v3562_v44 }
0x222a   :  { %844 = vrot.lane.b32.xlu0 %v3560_v41, %s3633_s25  ;;  %3563 = vrcp.f32 %v838_v45 }
0x2237   :  { %v3564_v3 = vpop.eup %3563 }
0x2238   :  { %v841_v4 = vmul.f32 %v3564_v3, %v3992_v27 }
0x2298   :  { %v1891_v2 = vpop.permute.xlu0 %1890 }
0x2299   :  { %v1893_v46 = vmul.f32 %v3556_v31, %v1891_v2 }
0x229b   :  { %1965 = vrot.lane.b32.xlu1 %v1893_v46, %s3633_s25 }
0x229c   :  { %v845_v33 = vpop.permute.xlu0 %844 }
0x229d   :  { %v847_v47 = vmul.f32 %v3564_v3, %v845_v33 }
0x229f   :  { %849 = vrot.lane.b32.xlu0 %v847_v47, %s3634_s26 }
0x230d   :  { %v4180_v48 = vpop.permute.xlu1 %1965 }
0x230e   :  { %3335 = vmatmul.mubr.msk.f32.vlgmr.msra.gmra.mxu1 %vm46_vm1, %v4180_v48 }
0x230f   :  { %3349 = vmatpush3.msra.mxu1 %v4118_v55  ;;  %3356 = vmatprep.mubr.msk.f32.mxu1 %vm3632_vm0, %v3631_v1 }
0x2310   :  { %3350 = vmatprep.subr.mxu1 %v3631_v1 }
0x2311   :  { %v850_v49 = vpop.permute.xlu0 %849  ;;  %3351 = vmatpush3.msra.mxu1 %v4127_v56 }
0x2312   :  { %v852_v50 = vadd.f32 %v850_v49, %v841_v4  ;;  %3352 = vmatprep.subr.mxu1 %v3631_v1 }
0x2313   :  { %3353 = vmatpush3.msra.mxu1 %v4134_v58 }
0x2314   :  { %3565 = vtanh.f32 %v852_v50  ;;  %865 = vst.msk [vmem:[#allocation4] sm:$0xf] %vm863_vm2, %v852_v50  ;;  %3354 = vmatprep.subr.mxu1 %v3631_v1 }
0x2315   :  { %3355 = vmatpush3.msra.mxu1 %v4141_v59  ;;  %v4204_v59 = vld [vmem:[%s4390_s4 + $0x18] sm:$0xff] }
0x2316   :  { %3370 = vmatprep.subr.mxu1 %v3631_v1 }
0x2321   :  { %v3566_v27 = vpop.eup %3565 }
0x2322   :  { %855 = vrot.lane.b32.xlu0 %v3566_v27, %s3635_s29 }
0x2394   :  { %v856_v12 = vpop.permute.xlu0 %855 }
0x2395   :  { %v858_v51 = vmul.f32 %v3564_v3, %v856_v12 }
0x2397   :  { %860 = vrot.lane.b32.xlu0 %v858_v51, %s3633_s25 }
0x23ce   :  { %v2035_v53 = vpop.f32.mrf.mxu1 }
0x23cf   :  { %v2039_v55 = vadd.f32 %v2035_v53, %v1961_v52 }
0x23d0   :  { %v3336_v56 = vpop.f32.mrf.mxu1 }
0x23d1   :  { %3567 = vtanh.f32 %v2039_v55 }
0x23de   :  { %v3568_v58 = vpop.eup %3567 }
0x23df   :  { %2049 = vrot.lane.b32.xlu1 %v3568_v58, %s3633_s25 }
0x2409   :  { %v861_v61 = vpop.permute.xlu0 %860 }
0x240a   :  { %864 = vst.msk [vmem:[#allocation2] sm:$0xf] %vm863_vm2, %v861_v61  ;;  %3346 = vmatmul.mubr.msk.f32.vlgmr.msra.gmra.mxu0 %vm46_vm1, %v861_v61 }
0x240b   :  { %3360 = vmatpush3.msra.mxu0 %v4204_v59  ;;  %3367 = vmatprep.mubr.msk.f32.mxu0 %vm3632_vm0, %v3631_v1 }
0x240c   :  { %3361 = vmatprep.subr.mxu0 %v3631_v1 }
0x240d   :  { %3362 = vmatpush3.msra.mxu0 %v4211_v34 }
0x240e   :  { %3363 = vmatprep.subr.mxu0 %v3631_v1 }
0x240f   :  { %3364 = vmatpush3.msra.mxu0 %v4220_v62 }
0x2410   :  { %3365 = vmatprep.subr.mxu0 %v3631_v1 }
0x2411   :  { %3366 = vmatpush3.msra.mxu0 %v4227_v24 }
0x2412   :  { %3368 = vmatmul.mubr.msk.f32.vlgmr.msra.gmra.mxu0 %vm46_vm1, %v4051_v57  ;;  %3381 = vmatprep.subr.mxu0 %v3631_v1  ;;  %v2915_v57 = vmul.f32 -1.442695, %v2039_v55 }
0x2413   :  { %3382 = vmatpush3.msra.mxu0 %v4204_v59  ;;  %3389 = vmatprep.mubr.msk.f32.mxu0 %vm3632_vm0, %v3631_v1 }
0x2414   :  { %3383 = vmatprep.subr.mxu0 %v3631_v1  ;;  %3569 = vpow2.f32 %v2915_v57 }
0x2415   :  { %3384 = vmatpush3.msra.mxu0 %v4211_v34 }
0x2416   :  { %3385 = vmatprep.subr.mxu0 %v3631_v1 }
0x2417   :  { %3386 = vmatpush3.msra.mxu0 %v4220_v62 }
0x2418   :  { %3387 = vmatprep.subr.mxu0 %v3631_v1 }
0x2419   :  { %3388 = vmatpush3.msra.mxu0 %v4227_v24 }
0x241a   :  { %3390 = vmatmul.mubr.msk.f32.vlgmr.msra.gmra.mxu0 %vm46_vm1, %v4091_v40  ;;  %3403 = vmatprep.subr.mxu0 %v3631_v1 }
0x241b   :  { %3404 = vmatpush3.msra.mxu0 %v4204_v59  ;;  %3411 = vmatprep.mubr.msk.f32.mxu0 %vm3632_vm0, %v3631_v1 }
0x241c   :  { %3405 = vmatprep.subr.mxu0 %v3631_v1 }
0x241d   :  { %3406 = vmatpush3.msra.mxu0 %v4211_v34 }
0x241e   :  { %3407 = vmatprep.subr.mxu0 %v3631_v1 }
0x241f   :  { %3408 = vmatpush3.msra.mxu0 %v4220_v62 }
0x2420   :  { %3409 = vmatprep.subr.mxu0 %v3631_v1 }
0x2421   :  { %3410 = vmatpush3.msra.mxu0 %v4227_v24  ;;  %v3570_v40 = vpop.eup %3569 }
0x2422   :  { %3412 = vmatmul.mubr.msk.f32.vlgmr.msra.gmra.mxu0 %vm46_vm1, %v4151_v20  ;;  %3425 = vmatprep.subr.mxu0 %v3631_v1  ;;  %v2043_v42 = vadd.f32 1.0, %v3570_v40 }
0x2423   :  { %3426 = vmatpush3.msra.mxu0 %v4204_v59  ;;  %3433 = vmatprep.mubr.msk.f32.mxu0 %vm3632_vm0, %v3631_v1 }
0x2424   :  { %3427 = vmatprep.subr.mxu0 %v3631_v1  ;;  %3571 = vrcp.f32 %v2043_v42 }
0x2425   :  { %3428 = vmatpush3.msra.mxu0 %v4211_v34 }
0x2426   :  { %3429 = vmatprep.subr.mxu0 %v3631_v1 }
0x2427   :  { %3430 = vmatpush3.msra.mxu0 %v4220_v62 }
0x2428   :  { %3431 = vmatprep.subr.mxu0 %v3631_v1 }
0x2429   :  { %3432 = vmatpush3.msra.mxu0 %v4227_v24 }
0x2431   :  { %v3572_v60 = vpop.eup %3571 }
0x2432   :  { %v2046_v6 = vmul.f32 %v3572_v60, %v4172_v38 }
0x2451   :  { %v2050_v63 = vpop.permute.xlu1 %2049 }
0x2452   :  { %v2052_v5 = vmul.f32 %v3572_v60, %v2050_v63 }
0x2454   :  { %2054 = vrot.lane.b32.xlu1 %v2052_v5, %s3634_s26 }
0x24c6   :  { %v2055_v7 = vpop.permute.xlu1 %2054 }
0x24c7   :  { %v4270_v9 = vadd.f32 %v2055_v7, %v2046_v6 }
0x24c9   :  { %3573 = vtanh.f32 %v4270_v9 }
0x24ca   :  { %v2132_v11 = vpop.f32.mrf.mxu0 }
0x24cc   :  { %v3347_v8 = vpop.f32.mrf.mxu0 }
0x24d2   :  { %v2321_v14 = vpop.f32.mrf.mxu0 }
0x24d3   :  { %v2322_v15 = vadd.f32 %v4276_v13, %v2321_v14 }
0x24d4   :  { %v3369_v17 = vpop.f32.mrf.mxu0 }
0x24d5   :  { %2326 = vst.msk [vmem:[%s4394_s8] sm:$0xf] %vm2325_vm3, %v2322_v15 }
0x24d6   :  { %v3574_v19 = vpop.eup %3573 }
0x24d7   :  { %2060 = vrot.lane.b32.xlu1 %v3574_v19, %s3635_s29 }
0x24da   :  { %v2465_v20 = vpop.f32.mrf.mxu0 }
0x24db   :  { %v2466_v21 = vadd.f32 %v4276_v13, %v2465_v20 }
0x24dc   :  { %v3391_v22 = vpop.f32.mrf.mxu0 }
0x24dd   :  { %2924 = vst.msk [vmem:[%s4394_s8 + $0x8] sm:$0xf] %vm2325_vm3, %v2466_v21 }
0x24e2   :  { %v2609_v23 = vpop.f32.mrf.mxu0 }
0x24e3   :  { %v2610_v25 = vadd.f32 %v4276_v13, %v2609_v23 }
0x24e4   :  { %v3413_v26 = vpop.f32.mrf.mxu0 }
0x24e5   :  { %2928 = vst.msk [vmem:[%s4394_s8 + $0x10] sm:$0xf] %vm2325_vm3, %v2610_v25 }
0x2549   :  { %v2061_v28 = vpop.permute.xlu1 %2060 }
0x254a   :  { %v2063_v29 = vmul.f32 %v3572_v60, %v2061_v28 }
0x254c   :  { %2137 = vrot.lane.b32.xlu1 %v2063_v29, %s3633_s25 }
0x25be   :  { %v2138_v30 = vpop.permute.xlu1 %2137 }
0x25bf   :  { %3357 = vmatmul.mubr.msk.f32.vlgmr.msra.gmra.mxu1 %vm46_vm1, %v2138_v30  ;;  %3434 = vmatmul.mubr.msk.f32.vlgmr.msra.gmra.mxu0 %vm46_vm1, %v2138_v30 }
0x25c0   :  { %3371 = vmatpush3.msra.mxu1 %v4204_v59  ;;  %3378 = vmatprep.mubr.msk.f32.mxu1 %vm3632_vm0, %v3631_v1 }
0x25c1   :  { %3372 = vmatprep.subr.mxu1 %v3631_v1 }
0x25c2   :  { %3373 = vmatpush3.msra.mxu1 %v4211_v34 }
0x25c3   :  { %3374 = vmatprep.subr.mxu1 %v3631_v1 }
0x25c4   :  { %3375 = vmatpush3.msra.mxu1 %v4220_v62 }
0x25c5   :  { %3376 = vmatprep.subr.mxu1 %v3631_v1 }
0x25c6   :  { %3377 = vmatpush3.msra.mxu1 %v4227_v24 }
0x25c7   :  { %3379 = vmatmul.mubr.msk.f32.vlgmr.msra.gmra.mxu1 %vm46_vm1, %v4071_v18  ;;  %3392 = vmatprep.subr.mxu1 %v3631_v1  ;;  %v2133_v18 = vadd.f32 %v4040_v37, %v2132_v11 }
0x25c8   :  { %3393 = vmatpush3.msra.mxu1 %v4204_v59  ;;  %3400 = vmatprep.mubr.msk.f32.mxu1 %vm3632_vm0, %v3631_v1 }
0x25c9   :  { %3394 = vmatprep.subr.mxu1 %v3631_v1 }
0x25ca   :  { %3395 = vmatpush3.msra.mxu1 %v4211_v34 }
0x25cb   :  { %3396 = vmatprep.subr.mxu1 %v3631_v1 }
0x25cc   :  { %3397 = vmatpush3.msra.mxu1 %v4220_v62 }
0x25cd   :  { %3398 = vmatprep.subr.mxu1 %v3631_v1 }
0x25ce   :  { %3399 = vmatpush3.msra.mxu1 %v4227_v24 }
0x25cf   :  { %3401 = vmatmul.mubr.msk.f32.vlgmr.msra.gmra.mxu1 %vm46_vm1, %v4111_v54  ;;  %3414 = vmatprep.subr.mxu1 %v3631_v1 }
0x25d0   :  { %3415 = vmatpush3.msra.mxu1 %v4204_v59  ;;  %3422 = vmatprep.mubr.msk.f32.mxu1 %vm3632_vm0, %v3631_v1 }
0x25d1   :  { %3416 = vmatprep.subr.mxu1 %v3631_v1 }
0x25d2   :  { %3417 = vmatpush3.msra.mxu1 %v4211_v34 }
0x25d3   :  { %3418 = vmatprep.subr.mxu1 %v3631_v1 }
0x25d4   :  { %3419 = vmatpush3.msra.mxu1 %v4220_v62 }
0x25d5   :  { %3420 = vmatprep.subr.mxu1 %v3631_v1 }
0x25d6   :  { %3421 = vmatpush3.msra.mxu1 %v4227_v24 }
0x25d7   :  { %3423 = vmatmul.mubr.msk.f32.vlgmr.msra.gmra.mxu1 %vm46_vm1, %v4180_v48  ;;  %3436 = vmatprep.subr.mxu1 %v3631_v1 }
0x25d8   :  { %3437 = vmatpush3.msra.mxu1 %v4204_v59  ;;  %3444 = vmatprep.mubr.msk.f32.mxu1 %vm3632_vm0, %v3631_v1 }
0x25d9   :  { %3438 = vmatprep.subr.mxu1 %v3631_v1 }
0x25da   :  { %3439 = vmatpush3.msra.mxu1 %v4211_v34 }
0x25db   :  { %3440 = vmatprep.subr.mxu1 %v3631_v1 }
0x25dc   :  { %3441 = vmatpush3.msra.mxu1 %v4220_v62 }
0x25dd   :  { %3442 = vmatprep.subr.mxu1 %v3631_v1 }
0x25de   :  { %3443 = vmatpush3.msra.mxu1 %v4227_v24 }
0x267f   :  { %v2207_v54 = vpop.f32.mrf.mxu1  ;;  %v2753_v31 = vpop.f32.mrf.mxu0 }
0x2680   :  { %v2211_v32 = vadd.f32 %v2207_v54, %v2133_v18  ;;  %v2754_v35 = vadd.f32 %v4276_v13, %v2753_v31 }
0x2681   :  { %v3358_v10 = vpop.f32.mrf.mxu1  ;;  %v3435_v16 = vpop.f32.mrf.mxu0 }
0x2682   :  { %3575 = vtanh.f32 %v2211_v32  ;;  %2932 = vst.msk [vmem:[%s4394_s8 + $0x18] sm:$0xf] %vm2325_vm3, %v2754_v35  ;;  %v2918_v2 = vmul.f32 -1.442695, %v2211_v32 }
0x2684   :  { %3577 = vpow2.f32 %v2918_v2 }
0x2687   :  { %v2393_v36 = vpop.f32.mrf.mxu1 }
0x2688   :  { %v2394_v1 = vadd.f32 %v4276_v13, %v2393_v36 }
0x2689   :  { %v3380_v38 = vpop.f32.mrf.mxu1 }
0x268a   :  { %2922 = vst.msk [vmem:[%s4394_s8 + $0x4] sm:$0xf] %vm2325_vm3, %v2394_v1 }
0x268f   :  { %v3576_v37 = vpop.eup %3575  ;;  %v2537_v39 = vpop.f32.mrf.mxu1 }
0x2690   :  { %v2538_v0 = vadd.f32 %v4276_v13, %v2537_v39  ;;  %2221 = vrot.lane.b32.xlu0 %v3576_v37, %s3633_s25 }
0x2691   :  { %v3402_v41 = vpop.f32.mrf.mxu1  ;;  %v3578_v46 = vpop.eup %3577 }
0x2692   :  { %2926 = vst.msk [vmem:[%s4394_s8 + $0xc] sm:$0xf] %vm2325_vm3, %v2538_v0  ;;  %v2215_v3 = vadd.f32 1.0, %v3578_v46 }
0x2694   :  { %3579 = vrcp.f32 %v2215_v3 }
0x2697   :  { %v2681_v43 = vpop.f32.mrf.mxu1 }
0x2698   :  { %v2682_v44 = vadd.f32 %v4276_v13, %v2681_v43 }
0x2699   :  { %v3424_v45 = vpop.f32.mrf.mxu1 }
0x269a   :  { %2930 = vst.msk [vmem:[%s4394_s8 + $0x14] sm:$0xf] %vm2325_vm3, %v2682_v44 }
0x26a1   :  { %v3580_v33 = vpop.eup %3579 }
0x26a2   :  { %v2218_v4 = vmul.f32 %v3580_v33, %v4270_v9 }
0x2702   :  { %v2222_v47 = vpop.permute.xlu0 %2221 }
0x2703   :  { %v2224_v48 = vmul.f32 %v3580_v33, %v2222_v47 }
0x2705   :  { %2226 = vrot.lane.b32.xlu1 %v2224_v48, %s3634_s26 }
0x2777   :  { %v2227_v49 = vpop.permute.xlu1 %2226 }
0x2778   :  { %v2229_v50 = vadd.f32 %v2227_v49, %v2218_v4 }
0x277a   :  { %3581 = vtanh.f32 %v2229_v50  ;;  %2243 = vst.msk [vmem:[#allocation4 + $0x4] sm:$0xf] %vm863_vm2, %v2229_v50 }
0x2787   :  { %v3582_v27 = vpop.eup %3581 }
0x2788   :  { %2232 = vrot.lane.b32.xlu0 %v3582_v27, %s3635_s29 }
0x27fa   :  { %v2233_v12 = vpop.permute.xlu0 %2232 }
0x27fb   :  { %v2235_v51 = vmul.f32 %v3580_v33, %v2233_v12 }
0x27fd   :  { %2237 = vrot.lane.b32.xlu1 %v2235_v51, %s3633_s25 }
0x286f   :  { %v2238_v52 = vpop.permute.xlu1 %2237 }
0x2870   :  { %2241 = vst.msk [vmem:[#allocation2 + $0x4] sm:$0xf] %vm863_vm2, %v2238_v52  ;;  %3445 = vmatmul.mubr.msk.f32.vlgmr.msra.gmra.mxu1 %vm46_vm1, %v2238_v52 }
0x2871   :  { %3598 = shalt.err (!%p3595_p4)
}
0x2872   :  { %s3638_s29 = smov 4   ;;  %s3607_s1 = scalar_lea.vmem %s2853_s27, 128 }
0x2873   :  { %2846 = dma.vmem_to_hbm [thread:$0]  %s2841_s0, 128, %s4395_s9, [#allocation3], %s3634_s26, %s3634_s26, %s3638_s29  }
0x2874   :  { %p3608_p5 = scmp.ne.s32.totalorder %s2853_s27, %s3607_s1  ;;  %p3612_p6 = scmp.lt.s32.totalorder %s2853_s27, %s2853_s27 }
0x2875   :  { %p3613_p7 = scmp.lt.s32.totalorder %s3607_s1, %s3607_s1 }
0x2877   :  { %p3614_p8 = por %p3613_p7, %p3612_p6 }
0x2879   :  { %p3615_p9 = pnand %p3614_p8, %p3608_p5 }
0x287b   :  { %3618 = shalt.err (!%p3615_p9)
}
0x287c   :  { %2858 = dma.vmem_to_hbm [thread:$0]  %s2853_s27, 128, %s4396_s10, [#allocation5], %s3634_s26, %s3634_s26, %s3638_s29  }
0x2930   :  { %v2827_v53 = vpop.f32.mrf.mxu1 }
0x2931   :  { %v2828_v55 = vadd.f32 %v4276_v13, %v2827_v53 }
0x2932   :  { %v3446_v56 = vpop.f32.mrf.mxu1 }
0x2933   :  { %2934 = vst.msk [vmem:[%s4394_s8 + $0x1c] sm:$0xf] %vm2325_vm3, %v2828_v55 }
0x2934   :  { %3627 = dma.done.wait [#allocation3], 128  }
0x2935   :  { %3628 = vsyncadd [#allocation3], 4294967168 }
0x2936   :  { %3629 = dma.done.wait [#allocation5], 128  }
0x2937   :  { %3630 = vsyncadd [#allocation5], 4294967168 }
0x2938   :  { %2867 = vsyncpa [#allocation3], 1 }
0x2939   :  { %2868 = vsyncpa [#allocation5], 1 }

</bundles_post_ra>
